<compile_context>
chip_gen: v6e
topology: v6e:2x2x1
jax: 0.10.0
libtpu: 0.0.40
codegen_flags: <defaults>
</compile_context>

<pallas_src>
import functools
from collections import namedtuple

import jax
import jax.numpy as jnp
from jax import lax
from jax.experimental import pallas as pl
from jax.experimental.pallas import tpu as pltpu

EPS = 1e-5  # PyTorch BatchNorm2d default eps

# Every conv emits its result in "row-padded flat" layout:
#   y[c, oh*row_w + ow] with row_w = Wo + 2; columns ow in [Wo, Wo+2) are junk.
ConvGeom = namedtuple("ConvGeom", "ho wo row_w l_out terms lq n_phases")


def _round_up(x, m):
    return ((x + m - 1) // m) * m


def _vmem_limit_bytes():
    """Per-generation VMEM budget: ~3/4 of capacity, capped at 96 MiB.
    v5e/v6e (128 MiB) -> 96 MiB; v7x (64 MiB) -> 48 MiB; fallback 48 MiB."""
    try:
        cap = int(pltpu.get_tpu_info().vmem_capacity_bytes)
    except Exception:
        cap = 64 * 1024 * 1024
    return int(min(96 * 1024 * 1024, cap * 3 // 4))


# ------------------------------- geometries -------------------------------- #
def _geom_3x3_s1(h, w):
    row_w = w + 2
    l_out = h * row_w
    terms = tuple((0, kh * row_w + kw) for kh in range(3) for kw in range(3))
    lq = max(off for _, off in terms) + l_out
    return ConvGeom(h, w, row_w, l_out, terms, lq, 1)


def _geom_3x3_s2(h, w):
    assert h % 2 == 0 and w % 2 == 0
    ho, wo = h // 2, w // 2
    row_w = wo + 2
    l_out = ho * row_w
    terms = tuple((2 * (kh % 2) + (kw % 2), (kh // 2) * row_w + (kw // 2))
                  for kh in range(3) for kw in range(3))
    lq = max(off for _, off in terms) + l_out
    return ConvGeom(ho, wo, row_w, l_out, terms, lq, 4)


def _geom_1x1(h, w, stride):
    assert h % stride == 0 and w % stride == 0
    ho, wo = h // stride, w // stride
    row_w = wo + 2
    l_out = ho * row_w
    return ConvGeom(ho, wo, row_w, l_out, ((0, 0),), l_out, 1)


# ----------------------------- Pallas kernels ------------------------------ #
def _conv3x3_stats_kernel(x_ref, w_ref, mask_ref, y_ref, psum_ref, psq_ref,
                          col_scr, *, terms, cin_p, l_out, lq, tb):
    """3x3 conv as ONE stacked-K matmul per step: the 9 lane-shifted slabs of
    all TB images are packed into a (9*cin_p, TB*l_out) VMEM scratch, then a
    single (cout_p, 9*cin_p) x (9*cin_p, TB*l_out) MXU dot produces the tile.
    Also emits per-channel BN partial sums from the f32 accumulator."""
    for b in range(tb):                                    # static unroll
        base = b * lq
        for t, (ph, off) in enumerate(terms):
            col_scr[t * cin_p:(t + 1) * cin_p, pl.ds(b * l_out, l_out)] = (
                x_ref[0, ph * cin_p:(ph + 1) * cin_p, pl.ds(base + off, l_out)])
    acc = jnp.dot(w_ref[...], col_scr[...], preferred_element_type=jnp.float32)
    y_ref[0] = acc.astype(y_ref.dtype)                     # bf16 intermediate
    am = acc * mask_ref[...]                               # mask junk columns
    psum_ref[0] = jnp.sum(am, axis=1, keepdims=True)
    psq_ref[0] = jnp.sum(am * acc, axis=1, keepdims=True)


def _conv1x1_stats_kernel(x_ref, w_ref, mask_ref, y_ref, psum_ref, psq_ref):
    """1x1 (projection shortcut) conv: the batched input slab is already the
    RHS, so a single dot with K = cin_p and no scratch copy."""
    acc = jnp.dot(w_ref[...], x_ref[0], preferred_element_type=jnp.float32)
    y_ref[0] = acc.astype(y_ref.dtype)
    am = acc * mask_ref[...]
    psum_ref[0] = jnp.sum(am, axis=1, keepdims=True)
    psq_ref[0] = jnp.sum(am * acc, axis=1, keepdims=True)


def _conv2_fused_kernel(y1_ref, s1_ref, b1_ref, mask_ref, w_ref,
                        act1_ref, y2_ref, psum_ref, psq_ref,
                        pad_scr, col_scr, *, terms, cin_p, l_out, lq, row_w, tb):
    """bn1-apply + ReLU fused with conv2 (+ bn2 partial stats).
    act1 = relu(y1*scale1+shift1) is written once (bf16) and re-padded into a
    VMEM scratch that directly feeds the stacked-K conv2 matmul -- the padded
    activation never touches HBM.  Only the halo lanes are zeroed."""
    a1 = y1_ref[0].astype(jnp.float32) * s1_ref[...] + b1_ref[...]
    a1 = jnp.maximum(a1, 0.0) * mask_ref[...]              # junk columns -> 0
    a1 = a1.astype(jnp.bfloat16)
    act1_ref[0] = a1
    halo = jnp.zeros((pad_scr.shape[0], row_w + 1), jnp.bfloat16)
    for b in range(tb):                                    # static unroll
        base = b * lq
        # image b occupies pad_scr[:, base:base+lq]; zero the two halos and
        # store the masked interior at offset row_w+1 (top pad row + left pad).
        pad_scr[:, pl.ds(base, row_w + 1)] = halo
        pad_scr[:, pl.ds(base + row_w + 1, l_out)] = a1[:, b * l_out:(b + 1) * l_out]
        pad_scr[:, pl.ds(base + row_w + 1 + l_out, row_w + 1)] = halo
        for t, (_, off) in enumerate(terms):
            col_scr[t * cin_p:(t + 1) * cin_p, pl.ds(b * l_out, l_out)] = (
                pad_scr[:, pl.ds(base + off, l_out)])
    acc = jnp.dot(w_ref[...], col_scr[...], preferred_element_type=jnp.float32)
    y2_ref[0] = acc.astype(y2_ref.dtype)
    am = acc * mask_ref[...]
    psum_ref[0] = jnp.sum(am, axis=1, keepdims=True)
    psq_ref[0] = jnp.sum(am * acc, axis=1, keepdims=True)


def _bn_residual_relu_kernel(y2_ref, s2_ref, b2_ref, ysc_ref, ss_ref, bs_ref,
                             act2_ref, out_ref):
    """act2 = bn2(conv2); out = relu(act2 + bn_s(shortcut)) -- fully fused."""
    a2 = y2_ref[0].astype(jnp.float32) * s2_ref[...] + b2_ref[...]
    sc = ysc_ref[0].astype(jnp.float32) * ss_ref[...] + bs_ref[...]
    act2_ref[0] = a2
    out_ref[0] = jnp.maximum(a2 + sc, 0.0)


# ---------------------------- pallas_call wrappers -------------------------- #
def _compiler_params(vmem_limit):
    return pltpu.CompilerParams(dimension_semantics=("parallel",),
                                vmem_limit_bytes=vmem_limit)


def conv3x3_bn_stats(x, w, mask, geom, cout_p, tb, vmem_limit):
    n_tiles, pcin, tlq = x.shape
    cin_p = pcin // geom.n_phases
    k = w.shape[1]
    tl = tb * geom.l_out
    kern = functools.partial(_conv3x3_stats_kernel, terms=geom.terms, cin_p=cin_p,
                             l_out=geom.l_out, lq=geom.lq, tb=tb)
    flops = int(2 * n_tiles * cout_p * k * tl)
    bytes_acc = int(x.size * x.dtype.itemsize
                    + n_tiles * (w.size * 2 + mask.size * 4)
                    + n_tiles * cout_p * (tl * 2 + 2 * 4))
    return pl.pallas_call(
        kern,
        grid=(n_tiles,),
        in_specs=[
            pl.BlockSpec((1, pcin, tlq), lambda i: (i, 0, 0)),
            pl.BlockSpec((cout_p, k), lambda i: (0, 0)),
            pl.BlockSpec((1, tl), lambda i: (0, 0)),
        ],
        out_shape=(
            jax.ShapeDtypeStruct((n_tiles, cout_p, tl), jnp.bfloat16),
            jax.ShapeDtypeStruct((n_tiles, cout_p, 1), jnp.float32),
            jax.ShapeDtypeStruct((n_tiles, cout_p, 1), jnp.float32),
        ),
        out_specs=(
            pl.BlockSpec((1, cout_p, tl), lambda i: (i, 0, 0)),
            pl.BlockSpec((1, cout_p, 1), lambda i: (i, 0, 0)),
            pl.BlockSpec((1, cout_p, 1), lambda i: (i, 0, 0)),
        ),
        scratch_shapes=[pltpu.VMEM((k, tl), jnp.bfloat16)],
        compiler_params=_compiler_params(vmem_limit),
        cost_estimate=pl.CostEstimate(flops=flops, transcendentals=0,
                                      bytes_accessed=bytes_acc),
    )(x, w, mask)


def conv1x1_bn_stats(x, w, mask, cout_p, tb, vmem_limit):
    n_tiles, cin_p, tl = x.shape
    flops = int(2 * n_tiles * cout_p * cin_p * tl)
    bytes_acc = int(x.size * 2 + n_tiles * (w.size * 2 + mask.size * 4)
                    + n_tiles * cout_p * (tl * 2 + 8))
    return pl.pallas_call(
        _conv1x1_stats_kernel,
        grid=(n_tiles,),
        in_specs=[
            pl.BlockSpec((1, cin_p, tl), lambda i: (i, 0, 0)),
            pl.BlockSpec((cout_p, cin_p), lambda i: (0, 0)),
            pl.BlockSpec((1, tl), lambda i: (0, 0)),
        ],
        out_shape=(
            jax.ShapeDtypeStruct((n_tiles, cout_p, tl), jnp.bfloat16),
            jax.ShapeDtypeStruct((n_tiles, cout_p, 1), jnp.float32),
            jax.ShapeDtypeStruct((n_tiles, cout_p, 1), jnp.float32),
        ),
        out_specs=(
            pl.BlockSpec((1, cout_p, tl), lambda i: (i, 0, 0)),
            pl.BlockSpec((1, cout_p, 1), lambda i: (i, 0, 0)),
            pl.BlockSpec((1, cout_p, 1), lambda i: (i, 0, 0)),
        ),
        compiler_params=_compiler_params(vmem_limit),
        cost_estimate=pl.CostEstimate(flops=flops, transcendentals=0,
                                      bytes_accessed=bytes_acc),
    )(x, w, mask)


def conv2_fused(y1, scale1, shift1, mask, w2, geom, cout_p, tb, vmem_limit):
    n_tiles, _, tl = y1.shape
    k = w2.shape[1]
    kern = functools.partial(_conv2_fused_kernel, terms=geom.terms, cin_p=cout_p,
                             l_out=geom.l_out, lq=geom.lq, row_w=geom.row_w, tb=tb)
    flops = int(2 * n_tiles * cout_p * k * tl)
    bytes_acc = int(y1.size * 2
                    + n_tiles * (w2.size * 2 + mask.size * 4 + cout_p * 8)
                    + 2 * n_tiles * cout_p * tl * 2       # act1 + y2 (bf16)
                    + n_tiles * cout_p * 8)               # stats
    return pl.pallas_call(
        kern,
        grid=(n_tiles,),
        in_specs=[
            pl.BlockSpec((1, cout_p, tl), lambda i: (i, 0, 0)),   # y1
            pl.BlockSpec((cout_p, 1), lambda i: (0, 0)),          # scale1
            pl.BlockSpec((cout_p, 1), lambda i: (0, 0)),          # shift1
            pl.BlockSpec((1, tl), lambda i: (0, 0)),              # mask
            pl.BlockSpec((cout_p, k), lambda i: (0, 0)),          # w2
        ],
        out_shape=(
            jax.ShapeDtypeStruct((n_tiles, cout_p, tl), jnp.bfloat16),  # act1
            jax.ShapeDtypeStruct((n_tiles, cout_p, tl), jnp.bfloat16),  # y2
            jax.ShapeDtypeStruct((n_tiles, cout_p, 1), jnp.float32),
            jax.ShapeDtypeStruct((n_tiles, cout_p, 1), jnp.float32),
        ),
        out_specs=(
            pl.BlockSpec((1, cout_p, tl), lambda i: (i, 0, 0)),
            pl.BlockSpec((1, cout_p, tl), lambda i: (i, 0, 0)),
            pl.BlockSpec((1, cout_p, 1), lambda i: (i, 0, 0)),
            pl.BlockSpec((1, cout_p, 1), lambda i: (i, 0, 0)),
        ),
        scratch_shapes=[pltpu.VMEM((cout_p, tb * geom.lq), jnp.bfloat16),
                        pltpu.VMEM((k, tb * geom.l_out), jnp.bfloat16)],
        compiler_params=_compiler_params(vmem_limit),
        cost_estimate=pl.CostEstimate(flops=flops, transcendentals=0,
                                      bytes_accessed=bytes_acc),
    )(y1, scale1, shift1, mask, w2)


def bn_residual_relu(y2, scale2, shift2, ysc, scale_s, shift_s, vmem_limit):
    n_tiles, cout_p, tl = y2.shape
    bytes_acc = int((y2.size + ysc.size) * 2 + 2 * n_tiles * cout_p * tl * 4
                    + n_tiles * cout_p * 16)
    return pl.pallas_call(
        _bn_residual_relu_kernel,
        grid=(n_tiles,),
        in_specs=[
            pl.BlockSpec((1, cout_p, tl), lambda i: (i, 0, 0)),
            pl.BlockSpec((cout_p, 1), lambda i: (0, 0)),
            pl.BlockSpec((cout_p, 1), lambda i: (0, 0)),
            pl.BlockSpec((1, cout_p, tl), lambda i: (i, 0, 0)),
            pl.BlockSpec((cout_p, 1), lambda i: (0, 0)),
            pl.BlockSpec((cout_p, 1), lambda i: (0, 0)),
        ],
        out_shape=(jax.ShapeDtypeStruct((n_tiles, cout_p, tl), jnp.float32),
                   jax.ShapeDtypeStruct((n_tiles, cout_p, tl), jnp.float32)),
        out_specs=(pl.BlockSpec((1, cout_p, tl), lambda i: (i, 0, 0)),
                   pl.BlockSpec((1, cout_p, tl), lambda i: (i, 0, 0))),
        compiler_params=_compiler_params(vmem_limit),
        cost_estimate=pl.CostEstimate(flops=int(6 * n_tiles * cout_p * tl),
                                      transcendentals=0, bytes_accessed=bytes_acc),
    )(y2, scale2, shift2, ysc, scale_s, shift_s)


# ------------------------------ host-side glue ------------------------------ #
def _choose_tb(n, per_image_bytes, budget, max_tb=16):
    """Largest divisor of n fitting the VMEM budget; mild preference for an
    even number of grid steps (v7x megacore) when it costs <= 2x tile shrink."""
    divs = [d for d in range(1, min(n, max_tb) + 1)
            if n % d == 0 and d * per_image_bytes <= budget]
    if not divs:
        return 1
    best = max(divs)
    n_tiles = n // best
    if n_tiles > 1 and n_tiles % 2 == 1:
        even = [d for d in divs if (n // d) % 2 == 0 and 2 * d >= best]
        if even:
            best = max(even)
    return best


def _batch_lanes(x, tb):
    """(N, R, L) -> (N//tb, R, tb*L): tb images concatenated along lanes."""
    n, r, l = x.shape
    return (x.reshape(n // tb, tb, r, l)
             .transpose(0, 2, 1, 3)
             .reshape(n // tb, r, tb * l))


def _prep_3x3_input(xc, stride, dtype):
    """(N, Cp, H, W) -> (N, P*Cp, Lq) flattened, spatially zero-padded input."""
    n, cp, h, w = xc.shape
    xpad = jnp.pad(xc, ((0, 0), (0, 0), (1, 1), (1, 1)))
    if stride == 1:
        g = _geom_3x3_s1(h, w)
        flat = xpad.reshape(n, cp, (h + 2) * (w + 2))
    else:
        g = _geom_3x3_s2(h, w)
        phases = [xpad[:, :, p::2, q::2] for p in (0, 1) for q in (0, 1)]
        ph = jnp.stack(phases, axis=1)                    # (N, 4, Cp, ho+1, wo+1)
        ph = jnp.pad(ph, ((0, 0), (0, 0), (0, 0), (0, 0),
                          (0, g.row_w - (g.wo + 1))))
        flat = ph.reshape(n, 4 * cp, (g.ho + 1) * g.row_w)
    flat = jnp.pad(flat, ((0, 0), (0, 0), (0, g.lq - flat.shape[-1])))
    return flat.astype(dtype), g


def _prep_1x1_input(xc, stride, dtype):
    n, cp, h, w = xc.shape
    g = _geom_1x1(h, w, stride)
    xs = xc[:, :, ::stride, ::stride]
    xs = jnp.pad(xs, ((0, 0), (0, 0), (0, 0), (0, 2)))
    return xs.reshape(n, cp, g.l_out).astype(dtype), g


def _prep_w3x3(w, cout_p, cin_p):
    """(Co, Ci, 3, 3) -> (Cout_p, 9*Cin_p); K row t*cin_p + c holds tap t=(kh*3+kw)."""
    co, ci = w.shape[0], w.shape[1]
    wp = jnp.pad(w, ((0, cout_p - co), (0, cin_p - ci), (0, 0), (0, 0)))
    wp = jnp.transpose(wp, (0, 2, 3, 1))                   # (Cout_p, 3, 3, Cin_p)
    return wp.reshape(cout_p, 9 * cin_p).astype(jnp.bfloat16)


def _prep_w1x1(w, cout_p, cin_p):
    co, ci = w.shape[0], w.shape[1]
    wp = jnp.pad(w, ((0, cout_p - co), (0, cin_p - ci), (0, 0), (0, 0)))
    return wp.reshape(cout_p, cin_p).astype(jnp.bfloat16)


def _valid_mask(g):
    row = (jnp.arange(g.row_w) < g.wo).astype(jnp.float32)
    return jnp.tile(row, (g.ho,)).reshape(1, g.l_out)


def _finalize_stats(psum, psumsq, count, gamma, beta, cout_p):
    """Combine per-tile partial sums -> folded per-channel (scale, shift)."""
    g = jnp.pad(gamma.reshape(-1, 1), ((0, cout_p - gamma.shape[0]), (0, 0)))
    b = jnp.pad(beta.reshape(-1, 1), ((0, cout_p - beta.shape[0]), (0, 0)))
    s = jnp.sum(psum, axis=0)
    ss = jnp.sum(psumsq, axis=0)
    mean = s / count
    var = jnp.maximum(ss / count - mean * mean, 0.0)   # biased var (PyTorch norm)
    scale = g * lax.rsqrt(var + EPS)
    shift = b - mean * scale
    return scale, shift


def init_basic_block_params(key, in_planes, planes, stride):
    ks = jax.random.split(key, 9)
    params = {
        "conv1_w": jax.random.normal(ks[0], (planes, in_planes, 3, 3), jnp.float32) * 0.1,
        "bn1_gamma": 1.0 + 0.1 * jax.random.normal(ks[1], (planes,), jnp.float32),
        "bn1_beta": 0.1 * jax.random.normal(ks[2], (planes,), jnp.float32),
        "conv2_w": jax.random.normal(ks[3], (planes, planes, 3, 3), jnp.float32) * 0.1,
        "bn2_gamma": 1.0 + 0.1 * jax.random.normal(ks[4], (planes,), jnp.float32),
        "bn2_beta": 0.1 * jax.random.normal(ks[5], (planes,), jnp.float32),
    }
    if stride != 1 or in_planes != planes:  # expansion == 1
        params["convs_w"] = jax.random.normal(ks[6], (planes, in_planes, 1, 1), jnp.float32) * 0.1
        params["bns_gamma"] = 1.0 + 0.1 * jax.random.normal(ks[7], (planes,), jnp.float32)
        params["bns_beta"] = 0.1 * jax.random.normal(ks[8], (planes,), jnp.float32)
    return params


def basic_block_forward(x_nchw, params, stride, b_index=0):
    assert stride in (1, 2)
    n, cin, h, w = x_nchw.shape
    planes = params["conv1_w"].shape[0]
    cin_p = _round_up(cin, 8)
    cout_p = _round_up(planes, 8)
    vmem_limit = _vmem_limit_bytes()

    g1 = _geom_3x3_s1(h, w) if stride == 1 else _geom_3x3_s2(h, w)
    ho, wo, row_w, l_out = g1.ho, g1.wo, g1.row_w, g1.l_out
    g2 = _geom_3x3_s1(ho, wo)                   # conv2: 3x3, stride 1, pad 1
    assert g2.l_out == l_out and g2.row_w == row_w

    # per-image VMEM footprint estimate (bf16 data, conv2 step dominates)
    per_image = 2 * (g1.n_phases * cin_p * g1.lq       # conv1 input slab
                     + 9 * max(cin_p, cout_p) * l_out  # stacked-K scratch
                     + cout_p * g2.lq                  # repad scratch
                     + 2 * 4 * cout_p * l_out)         # dbl-buffered io blocks
    tb = _choose_tb(n, per_image, vmem_limit // 2)
    n_tiles = n // tb

    xc = jnp.pad(x_nchw, ((0, 0), (0, cin_p - cin), (0, 0), (0, 0)))
    mask = jnp.tile(_valid_mask(g1), (1, tb))            # (1, tb*l_out) f32

    # ---- conv1 (stacked-K fused im2col) + bn1 partial stats -----------------
    x1, _ = _prep_3x3_input(xc, stride, jnp.bfloat16)
    x1 = _batch_lanes(x1, tb)
    w1 = _prep_w3x3(params["conv1_w"], cout_p, cin_p)
    y1, p1, q1 = conv3x3_bn_stats(x1, w1, mask, g1, cout_p, tb, vmem_limit)
    scale1, shift1 = _finalize_stats(p1, q1, n * ho * wo,
                                     params["bn1_gamma"], params["bn1_beta"], cout_p)

    # ---- bn1-apply + ReLU fused into conv2 + bn2 partial stats --------------
    w2 = _prep_w3x3(params["conv2_w"], cout_p, cout_p)
    act1_f, y2, p2, q2 = conv2_fused(y1, scale1, shift1, mask, w2, g2,
                                     cout_p, tb, vmem_limit)
    scale2, shift2 = _finalize_stats(p2, q2, n * ho * wo,
                                     params["bn2_gamma"], params["bn2_beta"], cout_p)

    # ---- shortcut ------------------------------------------------------------
    if "convs_w" in params:
        xs, gs = _prep_1x1_input(xc, stride, jnp.bfloat16)
        assert gs.l_out == l_out
        xs = _batch_lanes(xs, tb)
        ws = _prep_w1x1(params["convs_w"], cout_p, cin_p)
        ysc, ps, qs = conv1x1_bn_stats(xs, ws, mask, cout_p, tb, vmem_limit)
        scale_s, shift_s = _finalize_stats(ps, qs, n * ho * wo,
                                           params["bns_gamma"], params["bns_beta"], cout_p)
    else:
        assert cin_p == cout_p
        ysc = jnp.pad(xc, ((0, 0), (0, 0), (0, 0), (0, 2)))
        ysc = _batch_lanes(ysc.reshape(n, cout_p, l_out).astype(jnp.bfloat16), tb)
        scale_s = jnp.ones((cout_p, 1), jnp.float32)
        shift_s = jnp.zeros((cout_p, 1), jnp.float32)

    # ---- fused: bn2-apply + shortcut-bn-apply + residual add + ReLU ---------
    act2_f, out_f = bn_residual_relu(y2, scale2, shift2, ysc, scale_s, shift_s,
                                     vmem_limit)

    # ---- extract NCHW results (strip channel padding and junk columns) ------
    def _extract(flat):
        t = flat.reshape(n_tiles, cout_p, tb, ho, row_w)
        t = jnp.transpose(t, (0, 2, 1, 3, 4)).reshape(n, cout_p, ho, row_w)
        return t[:, :planes, :, :wo].astype(jnp.float32)

    act1 = _extract(act1_f)
    act2 = _extract(act2_f)
    out = _extract(out_f)
    return out, {b_index: act1, b_index + 1: act2}


# ----------------------------- pure-JAX reference --------------------------- #
def _reference(x, params, stride):
    dn = ("NCHW", "OIHW", "NCHW")

    def conv(inp, wgt, s, pad):
        return lax.conv_general_dilated(inp, wgt, (s, s), ((pad, pad), (pad, pad)),
                                        dimension_numbers=dn)

    def bn(y, gamma, beta):
        mean = jnp.mean(y, axis=(0, 2, 3), keepdims=True)
        var = jnp.mean((y - mean) ** 2, axis=(0, 2, 3), keepdims=True)
        yhat = (y - mean) * lax.rsqrt(var + EPS)
        return yhat * gamma.reshape(1, -1, 1, 1) + beta.reshape(1, -1, 1, 1)

    a1 = jax.nn.relu(bn(conv(x, params["conv1_w"], stride, 1),
                        params["bn1_gamma"], params["bn1_beta"]))
    a2 = bn(conv(a1, params["conv2_w"], 1, 1),
            params["bn2_gamma"], params["bn2_beta"])
    if "convs_w" in params:
        sc = bn(conv(x, params["convs_w"], stride, 0),
                params["bns_gamma"], params["bns_beta"])
    else:
        sc = x
    return jax.nn.relu(a2 + sc), a1, a2


if __name__ == "__main__":
    key = jax.random.PRNGKey(0)
    configs = [
        (4, 8, 2),   # stride-2 block with 1x1 projection shortcut
        (8, 8, 1),   # stride-1 block with identity shortcut
    ]
    for in_planes, planes, stride in configs:
        key, kx, kp = jax.random.split(key, 3)
        x = jax.random.normal(kx, (2, in_planes, 16, 16), jnp.float32)
        params = init_basic_block_params(kp, in_planes, planes, stride)

        fwd = jax.jit(functools.partial(basic_block_forward, stride=stride, b_index=0))
        out, act_layer = fwd(x, params)
        jax.block_until_ready((out, act_layer))

        ho, wo = 16 // stride, 16 // stride
        assert out.shape == (2, planes, ho, wo)
        assert act_layer[0].shape == (2, planes, ho, wo)
        assert act_layer[1].shape == (2, planes, ho, wo)

        # numerical sanity check (loose tolerance: bf16 MXU operands/intermediates)
        out_r, a1_r, a2_r = _reference(x, params, stride)
        for got, want in ((out, out_r), (act_layer[0], a1_r), (act_layer[1], a2_r)):
            err = float(jnp.max(jnp.abs(got - want)))
            assert err < 0.2, f"stride={stride}: max abs err {err}"

    print("KERNEL_OK")
</pallas_src>

<mosaic_0001>
module attributes {stable_mosaic.version = 11 : i64} {
  func.func @_conv1x1_stats_kernel(%arg0: i32, %arg1: memref<1x8x160xbf16, #tpu.memory_space<vmem>>, %arg2: memref<8x8xbf16, #tpu.memory_space<vmem>>, %arg3: memref<1x160xf32, #tpu.memory_space<vmem>>, %arg4: memref<1x8x160xbf16, #tpu.memory_space<vmem>>, %arg5: memref<1x8x1xf32, #tpu.memory_space<vmem>>, %arg6: memref<1x8x1xf32, #tpu.memory_space<vmem>>) attributes {dimension_semantics = [#tpu.dimension_semantics<parallel>], iteration_bounds = array<i64: 1>, scalar_prefetch = 0 : i64, scratch_operands = 0 : i64, tpu.core_type = #tpu.core_type<tc>, window_params = [{transform_indices = @transform_0, window_bounds = array<i64: 1, 8, 160>}, {pipeline_mode = #tpu.pipeline_mode<synchronous>, transform_indices = @transform_1, window_bounds = array<i64: 8, 8>}, {pipeline_mode = #tpu.pipeline_mode<synchronous>, transform_indices = @transform_2, window_bounds = array<i64: 1, 160>}, {transform_indices = @transform_3, window_bounds = array<i64: 1, 8, 160>}, {transform_indices = @transform_4, window_bounds = array<i64: 1, 8, 1>}, {transform_indices = @transform_5, window_bounds = array<i64: 1, 8, 1>}]} {
    %c0 = arith.constant 0 : index
    %c0_0 = arith.constant 0 : index
    %0 = vector.load %arg2[%c0, %c0_0] : memref<8x8xbf16, #tpu.memory_space<vmem>>, vector<8x8xbf16>
    %c0_1 = arith.constant 0 : index
    %c0_2 = arith.constant 0 : index
    %c0_3 = arith.constant 0 : index
    %1 = vector.load %arg1[%c0_1, %c0_2, %c0_3] : memref<1x8x160xbf16, #tpu.memory_space<vmem>>, vector<1x8x160xbf16>
    %2 = vector.shape_cast %1 : vector<1x8x160xbf16> to vector<8x160xbf16>
    %cst = arith.constant dense<0.000000e+00> : vector<8x160xf32>
    %3 = tpu.matmul %0, %2, %cst {dimension_numbers = #tpu.dot_dimension_numbers<[1], [0], [0], [1], [0, 0, 1, 1], [], []>} : vector<8x8xbf16>, vector<8x160xbf16>, vector<8x160xf32> -> vector<8x160xf32>
    %4 = arith.truncf %3 : vector<8x160xf32> to vector<8x160xbf16>
    %c0_4 = arith.constant 0 : index
    %c0_5 = arith.constant 0 : index
    %c0_6 = arith.constant 0 : index
    %5 = vector.load %arg4[%c0_4, %c0_5, %c0_6] : memref<1x8x160xbf16, #tpu.memory_space<vmem>>, vector<1x8x160xbf16>
    %6 = vector.shape_cast %5 : vector<1x8x160xbf16> to vector<8x160xbf16>
    %7 = vector.shape_cast %4 : vector<8x160xbf16> to vector<1x8x160xbf16>
    tpu.vector_store %arg4[%c0_4, %c0_5, %c0_6], %7 {strides = array<i32>} : memref<1x8x160xbf16, #tpu.memory_space<vmem>>, vector<1x8x160xbf16>,
    %c0_7 = arith.constant 0 : index
    %c0_8 = arith.constant 0 : index
    %8 = vector.load %arg3[%c0_7, %c0_8] : memref<1x160xf32, #tpu.memory_space<vmem>>, vector<1x160xf32>
    %9 = vector.broadcast %8 : vector<1x160xf32> to vector<8x160xf32>
    %10 = arith.mulf %3, %9 : vector<8x160xf32>
    %cst_9 = arith.constant dense<0.000000e+00> : vector<8xf32>
    %11 = vector.multi_reduction <add>, %10, %cst_9 [1] : vector<8x160xf32> to vector<8xf32>
    %12 = vector.shape_cast %11 : vector<8xf32> to vector<8x1xf32>
    %c0_10 = arith.constant 0 : index
    %c0_11 = arith.constant 0 : index
    %c0_12 = arith.constant 0 : index
    %13 = vector.load %arg5[%c0_10, %c0_11, %c0_12] : memref<1x8x1xf32, #tpu.memory_space<vmem>>, vector<1x8x1xf32>
    %14 = vector.shape_cast %13 : vector<1x8x1xf32> to vector<8x1xf32>
    %15 = vector.shape_cast %12 : vector<8x1xf32> to vector<1x8x1xf32>
    tpu.vector_store %arg5[%c0_10, %c0_11, %c0_12], %15 {strides = array<i32>} : memref<1x8x1xf32, #tpu.memory_space<vmem>>, vector<1x8x1xf32>,
    %16 = arith.mulf %10, %3 : vector<8x160xf32>
    %cst_13 = arith.constant dense<0.000000e+00> : vector<8xf32>
    %17 = vector.multi_reduction <add>, %16, %cst_13 [1] : vector<8x160xf32> to vector<8xf32>
    %18 = vector.shape_cast %17 : vector<8xf32> to vector<8x1xf32>
    %c0_14 = arith.constant 0 : index
    %c0_15 = arith.constant 0 : index
    %c0_16 = arith.constant 0 : index
    %19 = vector.load %arg6[%c0_14, %c0_15, %c0_16] : memref<1x8x1xf32, #tpu.memory_space<vmem>>, vector<1x8x1xf32>
    %20 = vector.shape_cast %19 : vector<1x8x1xf32> to vector<8x1xf32>
    %21 = vector.shape_cast %18 : vector<8x1xf32> to vector<1x8x1xf32>
    tpu.vector_store %arg6[%c0_14, %c0_15, %c0_16], %21 {strides = array<i32>} : memref<1x8x1xf32, #tpu.memory_space<vmem>>, vector<1x8x1xf32>,
    return
  }
  func.func @transform_0(%arg0: i32) -> (i32, i32, i32) {
    %c0_i32 = arith.constant 0 : i32
    %c0_i32_0 = arith.constant 0 : i32
    %c0_i32_1 = arith.constant 0 : i32
    return %arg0, %c0_i32, %c0_i32_0 : i32, i32, i32
  }
  func.func @transform_1(%arg0: i32) -> (i32, i32) {
    %c0_i32 = arith.constant 0 : i32
    %c0_i32_0 = arith.constant 0 : i32
    %c0_i32_1 = arith.constant 0 : i32
    return %c0_i32, %c0_i32_0 : i32, i32
  }
  func.func @transform_2(%arg0: i32) -> (i32, i32) {
    %c0_i32 = arith.constant 0 : i32
    %c0_i32_0 = arith.constant 0 : i32
    %c0_i32_1 = arith.constant 0 : i32
    return %c0_i32, %c0_i32_0 : i32, i32
  }
  func.func @transform_3(%arg0: i32) -> (i32, i32, i32) {
    %c0_i32 = arith.constant 0 : i32
    %c0_i32_0 = arith.constant 0 : i32
    %c0_i32_1 = arith.constant 0 : i32
    return %arg0, %c0_i32, %c0_i32_0 : i32, i32, i32
  }
  func.func @transform_4(%arg0: i32) -> (i32, i32, i32) {
    %c0_i32 = arith.constant 0 : i32
    %c0_i32_0 = arith.constant 0 : i32
    %c0_i32_1 = arith.constant 0 : i32
    return %arg0, %c0_i32, %c0_i32_0 : i32, i32, i32
  }
  func.func @transform_5(%arg0: i32) -> (i32, i32, i32) {
    %c0_i32 = arith.constant 0 : i32
    %c0_i32_0 = arith.constant 0 : i32
    %c0_i32_1 = arith.constant 0 : i32
    return %arg0, %c0_i32, %c0_i32_0 : i32, i32, i32
  }
}

module attributes {stable_mosaic.version = 11 : i64} {
  func.func @_conv3x3_stats_kernel(%arg0: i32, %arg1: memref<1x32x182xbf16, #tpu.memory_space<vmem>>, %arg2: memref<8x72xbf16, #tpu.memory_space<vmem>>, %arg3: memref<1x160xf32, #tpu.memory_space<vmem>>, %arg4: memref<1x8x160xbf16, #tpu.memory_space<vmem>>, %arg5: memref<1x8x1xf32, #tpu.memory_space<vmem>>, %arg6: memref<1x8x1xf32, #tpu.memory_space<vmem>>, %arg7: memref<72x160xbf16, #tpu.memory_space<vmem>>) attributes {dimension_semantics = [#tpu.dimension_semantics<parallel>], iteration_bounds = array<i64: 1>, scalar_prefetch = 0 : i64, scratch_operands = 1 : i64, tpu.core_type = #tpu.core_type<tc>, window_params = [{transform_indices = @transform_0, window_bounds = array<i64: 1, 32, 182>}, {pipeline_mode = #tpu.pipeline_mode<synchronous>, transform_indices = @transform_1, window_bounds = array<i64: 8, 72>}, {pipeline_mode = #tpu.pipeline_mode<synchronous>, transform_indices = @transform_2, window_bounds = array<i64: 1, 160>}, {transform_indices = @transform_3, window_bounds = array<i64: 1, 8, 160>}, {transform_indices = @transform_4, window_bounds = array<i64: 1, 8, 1>}, {transform_indices = @transform_5, window_bounds = array<i64: 1, 8, 1>}]} {
    %c0 = arith.constant 0 : index
    %c0_0 = arith.constant 0 : index
    %c0_1 = arith.constant 0 : index
    %0 = vector.load %arg1[%c0, %c0_0, %c0_1] : memref<1x32x182xbf16, #tpu.memory_space<vmem>>, vector<1x8x80xbf16>
    %1 = vector.shape_cast %0 : vector<1x8x80xbf16> to vector<8x80xbf16>
    %c0_2 = arith.constant 0 : index
    %c0_3 = arith.constant 0 : index
    %2 = vector.load %arg7[%c0_2, %c0_3] : memref<72x160xbf16, #tpu.memory_space<vmem>>, vector<8x80xbf16>
    tpu.vector_store %arg7[%c0_2, %c0_3], %1 {strides = array<i32>} : memref<72x160xbf16, #tpu.memory_space<vmem>>, vector<8x80xbf16>,
    %c0_4 = arith.constant 0 : index
    %c8 = arith.constant 8 : index
    %c0_5 = arith.constant 0 : index
    %3 = vector.load %arg1[%c0_4, %c8, %c0_5] : memref<1x32x182xbf16, #tpu.memory_space<vmem>>, vector<1x8x80xbf16>
    %4 = vector.shape_cast %3 : vector<1x8x80xbf16> to vector<8x80xbf16>
    %c8_6 = arith.constant 8 : index
    %c0_7 = arith.constant 0 : index
    %5 = vector.load %arg7[%c8_6, %c0_7] : memref<72x160xbf16, #tpu.memory_space<vmem>>, vector<8x80xbf16>
    tpu.vector_store %arg7[%c8_6, %c0_7], %4 {strides = array<i32>} : memref<72x160xbf16, #tpu.memory_space<vmem>>, vector<8x80xbf16>,
    %c0_8 = arith.constant 0 : index
    %c0_9 = arith.constant 0 : index
    %c1 = arith.constant 1 : index
    %6 = vector.load %arg1[%c0_8, %c0_9, %c1] : memref<1x32x182xbf16, #tpu.memory_space<vmem>>, vector<1x8x80xbf16>
    %7 = vector.shape_cast %6 : vector<1x8x80xbf16> to vector<8x80xbf16>
    %c16 = arith.constant 16 : index
    %c0_10 = arith.constant 0 : index
    %8 = vector.load %arg7[%c16, %c0_10] : memref<72x160xbf16, #tpu.memory_space<vmem>>, vector<8x80xbf16>
    tpu.vector_store %arg7[%c16, %c0_10], %7 {strides = array<i32>} : memref<72x160xbf16, #tpu.memory_space<vmem>>, vector<8x80xbf16>,
    %c0_11 = arith.constant 0 : index
    %c16_12 = arith.constant 16 : index
    %c0_13 = arith.constant 0 : index
    %9 = vector.load %arg1[%c0_11, %c16_12, %c0_13] : memref<1x32x182xbf16, #tpu.memory_space<vmem>>, vector<1x8x80xbf16>
    %10 = vector.shape_cast %9 : vector<1x8x80xbf16> to vector<8x80xbf16>
    %c24 = arith.constant 24 : index
    %c0_14 = arith.constant 0 : index
    %11 = vector.load %arg7[%c24, %c0_14] : memref<72x160xbf16, #tpu.memory_space<vmem>>, vector<8x80xbf16>
    tpu.vector_store %arg7[%c24, %c0_14], %10 {strides = array<i32>} : memref<72x160xbf16, #tpu.memory_space<vmem>>, vector<8x80xbf16>,
    %c0_15 = arith.constant 0 : index
    %c24_16 = arith.constant 24 : index
    %c0_17 = arith.constant 0 : index
    %12 = vector.load %arg1[%c0_15, %c24_16, %c0_17] : memref<1x32x182xbf16, #tpu.memory_space<vmem>>, vector<1x8x80xbf16>
    %13 = vector.shape_cast %12 : vector<1x8x80xbf16> to vector<8x80xbf16>
    %c32 = arith.constant 32 : index
    %c0_18 = arith.constant 0 : index
    %14 = vector.load %arg7[%c32, %c0_18] : memref<72x160xbf16, #tpu.memory_space<vmem>>, vector<8x80xbf16>
    tpu.vector_store %arg7[%c32, %c0_18], %13 {strides = array<i32>} : memref<72x160xbf16, #tpu.memory_space<vmem>>, vector<8x80xbf16>,
    %c0_19 = arith.constant 0 : index
    %c16_20 = arith.constant 16 : index
    %c1_21 = arith.constant 1 : index
    %15 = vector.load %arg1[%c0_19, %c16_20, %c1_21] : memref<1x32x182xbf16, #tpu.memory_space<vmem>>, vector<1x8x80xbf16>
    %16 = vector.shape_cast %15 : vector<1x8x80xbf16> to vector<8x80xbf16>
    %c40 = arith.constant 40 : index
    %c0_22 = arith.constant 0 : index
    %17 = vector.load %arg7[%c40, %c0_22] : memref<72x160xbf16, #tpu.memory_space<vmem>>, vector<8x80xbf16>
    tpu.vector_store %arg7[%c40, %c0_22], %16 {strides = array<i32>} : memref<72x160xbf16, #tpu.memory_space<vmem>>, vector<8x80xbf16>,
    %c0_23 = arith.constant 0 : index
    %c0_24 = arith.constant 0 : index
    %c10 = arith.constant 10 : index
    %18 = vector.load %arg1[%c0_23, %c0_24, %c10] : memref<1x32x182xbf16, #tpu.memory_space<vmem>>, vector<1x8x80xbf16>
    %19 = vector.shape_cast %18 : vector<1x8x80xbf16> to vector<8x80xbf16>
    %c48 = arith.constant 48 : index
    %c0_25 = arith.constant 0 : index
    %20 = vector.load %arg7[%c48, %c0_25] : memref<72x160xbf16, #tpu.memory_space<vmem>>, vector<8x80xbf16>
    tpu.vector_store %arg7[%c48, %c0_25], %19 {strides = array<i32>} : memref<72x160xbf16, #tpu.memory_space<vmem>>, vector<8x80xbf16>,
    %c0_26 = arith.constant 0 : index
    %c8_27 = arith.constant 8 : index
    %c10_28 = arith.constant 10 : index
    %21 = vector.load %arg1[%c0_26, %c8_27, %c10_28] : memref<1x32x182xbf16, #tpu.memory_space<vmem>>, vector<1x8x80xbf16>
    %22 = vector.shape_cast %21 : vector<1x8x80xbf16> to vector<8x80xbf16>
    %c56 = arith.constant 56 : index
    %c0_29 = arith.constant 0 : index
    %23 = vector.load %arg7[%c56, %c0_29] : memref<72x160xbf16, #tpu.memory_space<vmem>>, vector<8x80xbf16>
    tpu.vector_store %arg7[%c56, %c0_29], %22 {strides = array<i32>} : memref<72x160xbf16, #tpu.memory_space<vmem>>, vector<8x80xbf16>,
    %c0_30 = arith.constant 0 : index
    %c0_31 = arith.constant 0 : index
    %c11 = arith.constant 11 : index
    %24 = vector.load %arg1[%c0_30, %c0_31, %c11] : memref<1x32x182xbf16, #tpu.memory_space<vmem>>, vector<1x8x80xbf16>
    %25 = vector.shape_cast %24 : vector<1x8x80xbf16> to vector<8x80xbf16>
    %c64 = arith.constant 64 : index
    %c0_32 = arith.constant 0 : index
    %26 = vector.load %arg7[%c64, %c0_32] : memref<72x160xbf16, #tpu.memory_space<vmem>>, vector<8x80xbf16>
    tpu.vector_store %arg7[%c64, %c0_32], %25 {strides = array<i32>} : memref<72x160xbf16, #tpu.memory_space<vmem>>, vector<8x80xbf16>,
    %c0_33 = arith.constant 0 : index
    %c0_34 = arith.constant 0 : index
    %c91 = arith.constant 91 : index
    %27 = vector.load %arg1[%c0_33, %c0_34, %c91] : memref<1x32x182xbf16, #tpu.memory_space<vmem>>, vector<1x8x80xbf16>
    %28 = vector.shape_cast %27 : vector<1x8x80xbf16> to vector<8x80xbf16>
    %c0_35 = arith.constant 0 : index
    %c80 = arith.constant 80 : index
    %29 = vector.load %arg7[%c0_35, %c80] : memref<72x160xbf16, #tpu.memory_space<vmem>>, vector<8x80xbf16>
    tpu.vector_store %arg7[%c0_35, %c80], %28 {strides = array<i32>} : memref<72x160xbf16, #tpu.memory_space<vmem>>, vector<8x80xbf16>,
    %c0_36 = arith.constant 0 : index
    %c8_37 = arith.constant 8 : index
    %c91_38 = arith.constant 91 : index
    %30 = vector.load %arg1[%c0_36, %c8_37, %c91_38] : memref<1x32x182xbf16, #tpu.memory_space<vmem>>, vector<1x8x80xbf16>
    %31 = vector.shape_cast %30 : vector<1x8x80xbf16> to vector<8x80xbf16>
    %c8_39 = arith.constant 8 : index
    %c80_40 = arith.constant 80 : index
    %32 = vector.load %arg7[%c8_39, %c80_40] : memref<72x160xbf16, #tpu.memory_space<vmem>>, vector<8x80xbf16>
    tpu.vector_store %arg7[%c8_39, %c80_40], %31 {strides = array<i32>} : memref<72x160xbf16, #tpu.memory_space<vmem>>, vector<8x80xbf16>,
    %c0_41 = arith.constant 0 : index
    %c0_42 = arith.constant 0 : index
    %c92 = arith.constant 92 : index
    %33 = vector.load %arg1[%c0_41, %c0_42, %c92] : memref<1x32x182xbf16, #tpu.memory_space<vmem>>, vector<1x8x80xbf16>
    %34 = vector.shape_cast %33 : vector<1x8x80xbf16> to vector<8x80xbf16>
    %c16_43 = arith.constant 16 : index
    %c80_44 = arith.constant 80 : index
    %35 = vector.load %arg7[%c16_43, %c80_44] : memref<72x160xbf16, #tpu.memory_space<vmem>>, vector<8x80xbf16>
    tpu.vector_store %arg7[%c16_43, %c80_44], %34 {strides = array<i32>} : memref<72x160xbf16, #tpu.memory_space<vmem>>, vector<8x80xbf16>,
    %c0_45 = arith.constant 0 : index
    %c16_46 = arith.constant 16 : index
    %c91_47 = arith.constant 91 : index
    %36 = vector.load %arg1[%c0_45, %c16_46, %c91_47] : memref<1x32x182xbf16, #tpu.memory_space<vmem>>, vector<1x8x80xbf16>
    %37 = vector.shape_cast %36 : vector<1x8x80xbf16> to vector<8x80xbf16>
    %c24_48 = arith.constant 24 : index
    %c80_49 = arith.constant 80 : index
    %38 = vector.load %arg7[%c24_48, %c80_49] : memref<72x160xbf16, #tpu.memory_space<vmem>>, vector<8x80xbf16>
    tpu.vector_store %arg7[%c24_48, %c80_49], %37 {strides = array<i32>} : memref<72x160xbf16, #tpu.memory_space<vmem>>, vector<8x80xbf16>,
    %c0_50 = arith.constant 0 : index
    %c24_51 = arith.constant 24 : index
    %c91_52 = arith.constant 91 : index
    %39 = vector.load %arg1[%c0_50, %c24_51, %c91_52] : memref<1x32x182xbf16, #tpu.memory_space<vmem>>, vector<1x8x80xbf16>
    %40 = vector.shape_cast %39 : vector<1x8x80xbf16> to vector<8x80xbf16>
    %c32_53 = arith.constant 32 : index
    %c80_54 = arith.constant 80 : index
    %41 = vector.load %arg7[%c32_53, %c80_54] : memref<72x160xbf16, #tpu.memory_space<vmem>>, vector<8x80xbf16>
    tpu.vector_store %arg7[%c32_53, %c80_54], %40 {strides = array<i32>} : memref<72x160xbf16, #tpu.memory_space<vmem>>, vector<8x80xbf16>,
    %c0_55 = arith.constant 0 : index
    %c16_56 = arith.constant 16 : index
    %c92_57 = arith.constant 92 : index
    %42 = vector.load %arg1[%c0_55, %c16_56, %c92_57] : memref<1x32x182xbf16, #tpu.memory_space<vmem>>, vector<1x8x80xbf16>
    %43 = vector.shape_cast %42 : vector<1x8x80xbf16> to vector<8x80xbf16>
    %c40_58 = arith.constant 40 : index
    %c80_59 = arith.constant 80 : index
    %44 = vector.load %arg7[%c40_58, %c80_59] : memref<72x160xbf16, #tpu.memory_space<vmem>>, vector<8x80xbf16>
    tpu.vector_store %arg7[%c40_58, %c80_59], %43 {strides = array<i32>} : memref<72x160xbf16, #tpu.memory_space<vmem>>, vector<8x80xbf16>,
    %c0_60 = arith.constant 0 : index
    %c0_61 = arith.constant 0 : index
    %c101 = arith.constant 101 : index
    %45 = vector.load %arg1[%c0_60, %c0_61, %c101] : memref<1x32x182xbf16, #tpu.memory_space<vmem>>, vector<1x8x80xbf16>
    %46 = vector.shape_cast %45 : vector<1x8x80xbf16> to vector<8x80xbf16>
    %c48_62 = arith.constant 48 : index
    %c80_63 = arith.constant 80 : index
    %47 = vector.load %arg7[%c48_62, %c80_63] : memref<72x160xbf16, #tpu.memory_space<vmem>>, vector<8x80xbf16>
    tpu.vector_store %arg7[%c48_62, %c80_63], %46 {strides = array<i32>} : memref<72x160xbf16, #tpu.memory_space<vmem>>, vector<8x80xbf16>,
    %c0_64 = arith.constant 0 : index
    %c8_65 = arith.constant 8 : index
    %c101_66 = arith.constant 101 : index
    %48 = vector.load %arg1[%c0_64, %c8_65, %c101_66] : memref<1x32x182xbf16, #tpu.memory_space<vmem>>, vector<1x8x80xbf16>
    %49 = vector.shape_cast %48 : vector<1x8x80xbf16> to vector<8x80xbf16>
    %c56_67 = arith.constant 56 : index
    %c80_68 = arith.constant 80 : index
    %50 = vector.load %arg7[%c56_67, %c80_68] : memref<72x160xbf16, #tpu.memory_space<vmem>>, vector<8x80xbf16>
    tpu.vector_store %arg7[%c56_67, %c80_68], %49 {strides = array<i32>} : memref<72x160xbf16, #tpu.memory_space<vmem>>, vector<8x80xbf16>,
    %c0_69 = arith.constant 0 : index
    %c0_70 = arith.constant 0 : index
    %c102 = arith.constant 102 : index
    %51 = vector.load %arg1[%c0_69, %c0_70, %c102] : memref<1x32x182xbf16, #tpu.memory_space<vmem>>, vector<1x8x80xbf16>
    %52 = vector.shape_cast %51 : vector<1x8x80xbf16> to vector<8x80xbf16>
    %c64_71 = arith.constant 64 : index
    %c80_72 = arith.constant 80 : index
    %53 = vector.load %arg7[%c64_71, %c80_72] : memref<72x160xbf16, #tpu.memory_space<vmem>>, vector<8x80xbf16>
    tpu.vector_store %arg7[%c64_71, %c80_72], %52 {strides = array<i32>} : memref<72x160xbf16, #tpu.memory_space<vmem>>, vector<8x80xbf16>,
    %c0_73 = arith.constant 0 : index
    %c0_74 = arith.constant 0 : index
    %54 = vector.load %arg2[%c0_73, %c0_74] : memref<8x72xbf16, #tpu.memory_space<vmem>>, vector<8x72xbf16>
    %c0_75 = arith.constant 0 : index
    %c0_76 = arith.constant 0 : index
    %55 = vector.load %arg7[%c0_75, %c0_76] : memref<72x160xbf16, #tpu.memory_space<vmem>>, vector<72x160xbf16>
    %cst = arith.constant dense<0.000000e+00> : vector<8x160xf32>
    %56 = tpu.matmul %54, %55, %cst {dimension_numbers = #tpu.dot_dimension_numbers<[1], [0], [0], [1], [0, 0, 1, 1], [], []>} : vector<8x72xbf16>, vector<72x160xbf16>, vector<8x160xf32> -> vector<8x160xf32>
    %57 = arith.truncf %56 : vector<8x160xf32> to vector<8x160xbf16>
    %c0_77 = arith.constant 0 : index
    %c0_78 = arith.constant 0 : index
    %c0_79 = arith.constant 0 : index
    %58 = vector.load %arg4[%c0_77, %c0_78, %c0_79] : memref<1x8x160xbf16, #tpu.memory_space<vmem>>, vector<1x8x160xbf16>
    %59 = vector.shape_cast %58 : vector<1x8x160xbf16> to vector<8x160xbf16>
    %60 = vector.shape_cast %57 : vector<8x160xbf16> to vector<1x8x160xbf16>
    tpu.vector_store %arg4[%c0_77, %c0_78, %c0_79], %60 {strides = array<i32>} : memref<1x8x160xbf16, #tpu.memory_space<vmem>>, vector<1x8x160xbf16>,
    %c0_80 = arith.constant 0 : index
    %c0_81 = arith.constant 0 : index
    %61 = vector.load %arg3[%c0_80, %c0_81] : memref<1x160xf32, #tpu.memory_space<vmem>>, vector<1x160xf32>
    %62 = vector.broadcast %61 : vector<1x160xf32> to vector<8x160xf32>
    %63 = arith.mulf %56, %62 : vector<8x160xf32>
    %cst_82 = arith.constant dense<0.000000e+00> : vector<8xf32>
    %64 = vector.multi_reduction <add>, %63, %cst_82 [1] : vector<8x160xf32> to vector<8xf32>
    %65 = vector.shape_cast %64 : vector<8xf32> to vector<8x1xf32>
    %c0_83 = arith.constant 0 : index
    %c0_84 = arith.constant 0 : index
    %c0_85 = arith.constant 0 : index
    %66 = vector.load %arg5[%c0_83, %c0_84, %c0_85] : memref<1x8x1xf32, #tpu.memory_space<vmem>>, vector<1x8x1xf32>
    %67 = vector.shape_cast %66 : vector<1x8x1xf32> to vector<8x1xf32>
    %68 = vector.shape_cast %65 : vector<8x1xf32> to vector<1x8x1xf32>
    tpu.vector_store %arg5[%c0_83, %c0_84, %c0_85], %68 {strides = array<i32>} : memref<1x8x1xf32, #tpu.memory_space<vmem>>, vector<1x8x1xf32>,
    %69 = arith.mulf %63, %56 : vector<8x160xf32>
    %cst_86 = arith.constant dense<0.000000e+00> : vector<8xf32>
    %70 = vector.multi_reduction <add>, %69, %cst_86 [1] : vector<8x160xf32> to vector<8xf32>
    %71 = vector.shape_cast %70 : vector<8xf32> to vector<8x1xf32>
    %c0_87 = arith.constant 0 : index
    %c0_88 = arith.constant 0 : index
    %c0_89 = arith.constant 0 : index
    %72 = vector.load %arg6[%c0_87, %c0_88, %c0_89] : memref<1x8x1xf32, #tpu.memory_space<vmem>>, vector<1x8x1xf32>
    %73 = vector.shape_cast %72 : vector<1x8x1xf32> to vector<8x1xf32>
    %74 = vector.shape_cast %71 : vector<8x1xf32> to vector<1x8x1xf32>
    tpu.vector_store %arg6[%c0_87, %c0_88, %c0_89], %74 {strides = array<i32>} : memref<1x8x1xf32, #tpu.memory_space<vmem>>, vector<1x8x1xf32>,
    return
  }
  func.func @transform_0(%arg0: i32) -> (i32, i32, i32) {
    %c0_i32 = arith.constant 0 : i32
    %c0_i32_0 = arith.constant 0 : i32
    %c0_i32_1 = arith.constant 0 : i32
    return %arg0, %c0_i32, %c0_i32_0 : i32, i32, i32
  }
  func.func @transform_1(%arg0: i32) -> (i32, i32) {
    %c0_i32 = arith.constant 0 : i32
    %c0_i32_0 = arith.constant 0 : i32
    %c0_i32_1 = arith.constant 0 : i32
    return %c0_i32, %c0_i32_0 : i32, i32
  }
  func.func @transform_2(%arg0: i32) -> (i32, i32) {
    %c0_i32 = arith.constant 0 : i32
    %c0_i32_0 = arith.constant 0 : i32
    %c0_i32_1 = arith.constant 0 : i32
    return %c0_i32, %c0_i32_0 : i32, i32
  }
  func.func @transform_3(%arg0: i32) -> (i32, i32, i32) {
    %c0_i32 = arith.constant 0 : i32
    %c0_i32_0 = arith.constant 0 : i32
    %c0_i32_1 = arith.constant 0 : i32
    return %arg0, %c0_i32, %c0_i32_0 : i32, i32, i32
  }
  func.func @transform_4(%arg0: i32) -> (i32, i32, i32) {
    %c0_i32 = arith.constant 0 : i32
    %c0_i32_0 = arith.constant 0 : i32
    %c0_i32_1 = arith.constant 0 : i32
    return %arg0, %c0_i32, %c0_i32_0 : i32, i32, i32
  }
  func.func @transform_5(%arg0: i32) -> (i32, i32, i32) {
    %c0_i32 = arith.constant 0 : i32
    %c0_i32_0 = arith.constant 0 : i32
    %c0_i32_1 = arith.constant 0 : i32
    return %arg0, %c0_i32, %c0_i32_0 : i32, i32, i32
  }
}

module attributes {stable_mosaic.version = 11 : i64} {
  func.func @_conv2_fused_kernel(%arg0: i32, %arg1: memref<1x8x160xbf16, #tpu.memory_space<vmem>>, %arg2: memref<8x1xf32, #tpu.memory_space<vmem>>, %arg3: memref<8x1xf32, #tpu.memory_space<vmem>>, %arg4: memref<1x160xf32, #tpu.memory_space<vmem>>, %arg5: memref<8x72xbf16, #tpu.memory_space<vmem>>, %arg6: memref<1x8x160xbf16, #tpu.memory_space<vmem>>, %arg7: memref<1x8x160xbf16, #tpu.memory_space<vmem>>, %arg8: memref<1x8x1xf32, #tpu.memory_space<vmem>>, %arg9: memref<1x8x1xf32, #tpu.memory_space<vmem>>, %arg10: memref<8x204xbf16, #tpu.memory_space<vmem>>, %arg11: memref<72x160xbf16, #tpu.memory_space<vmem>>) attributes {dimension_semantics = [#tpu.dimension_semantics<parallel>], iteration_bounds = array<i64: 1>, scalar_prefetch = 0 : i64, scratch_operands = 2 : i64, tpu.core_type = #tpu.core_type<tc>, window_params = [{transform_indices = @transform_0, window_bounds = array<i64: 1, 8, 160>}, {pipeline_mode = #tpu.pipeline_mode<synchronous>, transform_indices = @transform_1, window_bounds = array<i64: 8, 1>}, {pipeline_mode = #tpu.pipeline_mode<synchronous>, transform_indices = @transform_2, window_bounds = array<i64: 8, 1>}, {pipeline_mode = #tpu.pipeline_mode<synchronous>, transform_indices = @transform_3, window_bounds = array<i64: 1, 160>}, {pipeline_mode = #tpu.pipeline_mode<synchronous>, transform_indices = @transform_4, window_bounds = array<i64: 8, 72>}, {transform_indices = @transform_5, window_bounds = array<i64: 1, 8, 160>}, {transform_indices = @transform_6, window_bounds = array<i64: 1, 8, 160>}, {transform_indices = @transform_7, window_bounds = array<i64: 1, 8, 1>}, {transform_indices = @transform_8, window_bounds = array<i64: 1, 8, 1>}]} {
    %c0 = arith.constant 0 : index
    %c0_0 = arith.constant 0 : index
    %c0_1 = arith.constant 0 : index
    %0 = vector.load %arg1[%c0, %c0_0, %c0_1] : memref<1x8x160xbf16, #tpu.memory_space<vmem>>, vector<1x8x160xbf16>
    %1 = vector.shape_cast %0 : vector<1x8x160xbf16> to vector<8x160xbf16>
    %2 = arith.extf %1 : vector<8x160xbf16> to vector<8x160xf32>
    %c0_2 = arith.constant 0 : index
    %c0_3 = arith.constant 0 : index
    %3 = vector.load %arg2[%c0_2, %c0_3] : memref<8x1xf32, #tpu.memory_space<vmem>>, vector<8x1xf32>
    %4 = vector.broadcast %3 : vector<8x1xf32> to vector<8x160xf32>
    %5 = arith.mulf %2, %4 : vector<8x160xf32>
    %c0_4 = arith.constant 0 : index
    %c0_5 = arith.constant 0 : index
    %6 = vector.load %arg3[%c0_4, %c0_5] : memref<8x1xf32, #tpu.memory_space<vmem>>, vector<8x1xf32>
    %7 = vector.broadcast %6 : vector<8x1xf32> to vector<8x160xf32>
    %8 = arith.addf %5, %7 : vector<8x160xf32>
    %cst = arith.constant 0.000000e+00 : f32
    %9 = vector.broadcast %cst : f32 to vector<8x160xf32>
    %10 = arith.maximumf %8, %9 : vector<8x160xf32>
    %c0_6 = arith.constant 0 : index
    %c0_7 = arith.constant 0 : index
    %11 = vector.load %arg4[%c0_6, %c0_7] : memref<1x160xf32, #tpu.memory_space<vmem>>, vector<1x160xf32>
    %12 = vector.broadcast %11 : vector<1x160xf32> to vector<8x160xf32>
    %13 = arith.mulf %10, %12 : vector<8x160xf32>
    %14 = arith.truncf %13 : vector<8x160xf32> to vector<8x160xbf16>
    %c0_8 = arith.constant 0 : index
    %c0_9 = arith.constant 0 : index
    %c0_10 = arith.constant 0 : index
    %15 = vector.load %arg6[%c0_8, %c0_9, %c0_10] : memref<1x8x160xbf16, #tpu.memory_space<vmem>>, vector<1x8x160xbf16>
    %16 = vector.shape_cast %15 : vector<1x8x160xbf16> to vector<8x160xbf16>
    %17 = vector.shape_cast %14 : vector<8x160xbf16> to vector<1x8x160xbf16>
    tpu.vector_store %arg6[%c0_8, %c0_9, %c0_10], %17 {strides = array<i32>} : memref<1x8x160xbf16, #tpu.memory_space<vmem>>, vector<1x8x160xbf16>,
    %cst_11 = arith.constant 0.000000e+00 : bf16
    %18 = vector.broadcast %cst_11 : bf16 to vector<8x11xbf16>
    %c0_12 = arith.constant 0 : index
    %c0_13 = arith.constant 0 : index
    %19 = vector.load %arg10[%c0_12, %c0_13] : memref<8x204xbf16, #tpu.memory_space<vmem>>, vector<8x11xbf16>
    tpu.vector_store %arg10[%c0_12, %c0_13], %18 {strides = array<i32>} : memref<8x204xbf16, #tpu.memory_space<vmem>>, vector<8x11xbf16>,
    %20 = vector.extract_strided_slice %14 {offsets = [0, 0], sizes = [8, 80], strides = [1, 1]} : vector<8x160xbf16> to vector<8x80xbf16>
    %c0_14 = arith.constant 0 : index
    %c11 = arith.constant 11 : index
    %21 = vector.load %arg10[%c0_14, %c11] : memref<8x204xbf16, #tpu.memory_space<vmem>>, vector<8x80xbf16>
    tpu.vector_store %arg10[%c0_14, %c11], %20 {strides = array<i32>} : memref<8x204xbf16, #tpu.memory_space<vmem>>, vector<8x80xbf16>,
    %c0_15 = arith.constant 0 : index
    %c91 = arith.constant 91 : index
    %22 = vector.load %arg10[%c0_15, %c91] : memref<8x204xbf16, #tpu.memory_space<vmem>>, vector<8x11xbf16>
    tpu.vector_store %arg10[%c0_15, %c91], %18 {strides = array<i32>} : memref<8x204xbf16, #tpu.memory_space<vmem>>, vector<8x11xbf16>,
    %c0_16 = arith.constant 0 : index
    %c0_17 = arith.constant 0 : index
    %23 = vector.load %arg10[%c0_16, %c0_17] : memref<8x204xbf16, #tpu.memory_space<vmem>>, vector<8x80xbf16>
    %c0_18 = arith.constant 0 : index
    %c0_19 = arith.constant 0 : index
    %24 = vector.load %arg11[%c0_18, %c0_19] : memref<72x160xbf16, #tpu.memory_space<vmem>>, vector<8x80xbf16>
    tpu.vector_store %arg11[%c0_18, %c0_19], %23 {strides = array<i32>} : memref<72x160xbf16, #tpu.memory_space<vmem>>, vector<8x80xbf16>,
    %c0_20 = arith.constant 0 : index
    %c1 = arith.constant 1 : index
    %25 = vector.load %arg10[%c0_20, %c1] : memref<8x204xbf16, #tpu.memory_space<vmem>>, vector<8x80xbf16>
    %c8 = arith.constant 8 : index
    %c0_21 = arith.constant 0 : index
    %26 = vector.load %arg11[%c8, %c0_21] : memref<72x160xbf16, #tpu.memory_space<vmem>>, vector<8x80xbf16>
    tpu.vector_store %arg11[%c8, %c0_21], %25 {strides = array<i32>} : memref<72x160xbf16, #tpu.memory_space<vmem>>, vector<8x80xbf16>,
    %c0_22 = arith.constant 0 : index
    %c2 = arith.constant 2 : index
    %27 = vector.load %arg10[%c0_22, %c2] : memref<8x204xbf16, #tpu.memory_space<vmem>>, vector<8x80xbf16>
    %c16 = arith.constant 16 : index
    %c0_23 = arith.constant 0 : index
    %28 = vector.load %arg11[%c16, %c0_23] : memref<72x160xbf16, #tpu.memory_space<vmem>>, vector<8x80xbf16>
    tpu.vector_store %arg11[%c16, %c0_23], %27 {strides = array<i32>} : memref<72x160xbf16, #tpu.memory_space<vmem>>, vector<8x80xbf16>,
    %c0_24 = arith.constant 0 : index
    %c10 = arith.constant 10 : index
    %29 = vector.load %arg10[%c0_24, %c10] : memref<8x204xbf16, #tpu.memory_space<vmem>>, vector<8x80xbf16>
    %c24 = arith.constant 24 : index
    %c0_25 = arith.constant 0 : index
    %30 = vector.load %arg11[%c24, %c0_25] : memref<72x160xbf16, #tpu.memory_space<vmem>>, vector<8x80xbf16>
    tpu.vector_store %arg11[%c24, %c0_25], %29 {strides = array<i32>} : memref<72x160xbf16, #tpu.memory_space<vmem>>, vector<8x80xbf16>,
    %c0_26 = arith.constant 0 : index
    %c11_27 = arith.constant 11 : index
    %31 = vector.load %arg10[%c0_26, %c11_27] : memref<8x204xbf16, #tpu.memory_space<vmem>>, vector<8x80xbf16>
    %c32 = arith.constant 32 : index
    %c0_28 = arith.constant 0 : index
    %32 = vector.load %arg11[%c32, %c0_28] : memref<72x160xbf16, #tpu.memory_space<vmem>>, vector<8x80xbf16>
    tpu.vector_store %arg11[%c32, %c0_28], %31 {strides = array<i32>} : memref<72x160xbf16, #tpu.memory_space<vmem>>, vector<8x80xbf16>,
    %c0_29 = arith.constant 0 : index
    %c12 = arith.constant 12 : index
    %33 = vector.load %arg10[%c0_29, %c12] : memref<8x204xbf16, #tpu.memory_space<vmem>>, vector<8x80xbf16>
    %c40 = arith.constant 40 : index
    %c0_30 = arith.constant 0 : index
    %34 = vector.load %arg11[%c40, %c0_30] : memref<72x160xbf16, #tpu.memory_space<vmem>>, vector<8x80xbf16>
    tpu.vector_store %arg11[%c40, %c0_30], %33 {strides = array<i32>} : memref<72x160xbf16, #tpu.memory_space<vmem>>, vector<8x80xbf16>,
    %c0_31 = arith.constant 0 : index
    %c20 = arith.constant 20 : index
    %35 = vector.load %arg10[%c0_31, %c20] : memref<8x204xbf16, #tpu.memory_space<vmem>>, vector<8x80xbf16>
    %c48 = arith.constant 48 : index
    %c0_32 = arith.constant 0 : index
    %36 = vector.load %arg11[%c48, %c0_32] : memref<72x160xbf16, #tpu.memory_space<vmem>>, vector<8x80xbf16>
    tpu.vector_store %arg11[%c48, %c0_32], %35 {strides = array<i32>} : memref<72x160xbf16, #tpu.memory_space<vmem>>, vector<8x80xbf16>,
    %c0_33 = arith.constant 0 : index
    %c21 = arith.constant 21 : index
    %37 = vector.load %arg10[%c0_33, %c21] : memref<8x204xbf16, #tpu.memory_space<vmem>>, vector<8x80xbf16>
    %c56 = arith.constant 56 : index
    %c0_34 = arith.constant 0 : index
    %38 = vector.load %arg11[%c56, %c0_34] : memref<72x160xbf16, #tpu.memory_space<vmem>>, vector<8x80xbf16>
    tpu.vector_store %arg11[%c56, %c0_34], %37 {strides = array<i32>} : memref<72x160xbf16, #tpu.memory_space<vmem>>, vector<8x80xbf16>,
    %c0_35 = arith.constant 0 : index
    %c22 = arith.constant 22 : index
    %39 = vector.load %arg10[%c0_35, %c22] : memref<8x204xbf16, #tpu.memory_space<vmem>>, vector<8x80xbf16>
    %c64 = arith.constant 64 : index
    %c0_36 = arith.constant 0 : index
    %40 = vector.load %arg11[%c64, %c0_36] : memref<72x160xbf16, #tpu.memory_space<vmem>>, vector<8x80xbf16>
    tpu.vector_store %arg11[%c64, %c0_36], %39 {strides = array<i32>} : memref<72x160xbf16, #tpu.memory_space<vmem>>, vector<8x80xbf16>,
    %c0_37 = arith.constant 0 : index
    %c102 = arith.constant 102 : index
    %41 = vector.load %arg10[%c0_37, %c102] : memref<8x204xbf16, #tpu.memory_space<vmem>>, vector<8x11xbf16>
    tpu.vector_store %arg10[%c0_37, %c102], %18 {strides = array<i32>} : memref<8x204xbf16, #tpu.memory_space<vmem>>, vector<8x11xbf16>,
    %42 = vector.extract_strided_slice %14 {offsets = [0, 80], sizes = [8, 80], strides = [1, 1]} : vector<8x160xbf16> to vector<8x80xbf16>
    %c0_38 = arith.constant 0 : index
    %c113 = arith.constant 113 : index
    %43 = vector.load %arg10[%c0_38, %c113] : memref<8x204xbf16, #tpu.memory_space<vmem>>, vector<8x80xbf16>
    tpu.vector_store %arg10[%c0_38, %c113], %42 {strides = array<i32>} : memref<8x204xbf16, #tpu.memory_space<vmem>>, vector<8x80xbf16>,
    %c0_39 = arith.constant 0 : index
    %c193 = arith.constant 193 : index
    %44 = vector.load %arg10[%c0_39, %c193] : memref<8x204xbf16, #tpu.memory_space<vmem>>, vector<8x11xbf16>
    tpu.vector_store %arg10[%c0_39, %c193], %18 {strides = array<i32>} : memref<8x204xbf16, #tpu.memory_space<vmem>>, vector<8x11xbf16>,
    %c0_40 = arith.constant 0 : index
    %c102_41 = arith.constant 102 : index
    %45 = vector.load %arg10[%c0_40, %c102_41] : memref<8x204xbf16, #tpu.memory_space<vmem>>, vector<8x80xbf16>
    %c0_42 = arith.constant 0 : index
    %c80 = arith.constant 80 : index
    %46 = vector.load %arg11[%c0_42, %c80] : memref<72x160xbf16, #tpu.memory_space<vmem>>, vector<8x80xbf16>
    tpu.vector_store %arg11[%c0_42, %c80], %45 {strides = array<i32>} : memref<72x160xbf16, #tpu.memory_space<vmem>>, vector<8x80xbf16>,
    %c0_43 = arith.constant 0 : index
    %c103 = arith.constant 103 : index
    %47 = vector.load %arg10[%c0_43, %c103] : memref<8x204xbf16, #tpu.memory_space<vmem>>, vector<8x80xbf16>
    %c8_44 = arith.constant 8 : index
    %c80_45 = arith.constant 80 : index
    %48 = vector.load %arg11[%c8_44, %c80_45] : memref<72x160xbf16, #tpu.memory_space<vmem>>, vector<8x80xbf16>
    tpu.vector_store %arg11[%c8_44, %c80_45], %47 {strides = array<i32>} : memref<72x160xbf16, #tpu.memory_space<vmem>>, vector<8x80xbf16>,
    %c0_46 = arith.constant 0 : index
    %c104 = arith.constant 104 : index
    %49 = vector.load %arg10[%c0_46, %c104] : memref<8x204xbf16, #tpu.memory_space<vmem>>, vector<8x80xbf16>
    %c16_47 = arith.constant 16 : index
    %c80_48 = arith.constant 80 : index
    %50 = vector.load %arg11[%c16_47, %c80_48] : memref<72x160xbf16, #tpu.memory_space<vmem>>, vector<8x80xbf16>
    tpu.vector_store %arg11[%c16_47, %c80_48], %49 {strides = array<i32>} : memref<72x160xbf16, #tpu.memory_space<vmem>>, vector<8x80xbf16>,
    %c0_49 = arith.constant 0 : index
    %c112 = arith.constant 112 : index
    %51 = vector.load %arg10[%c0_49, %c112] : memref<8x204xbf16, #tpu.memory_space<vmem>>, vector<8x80xbf16>
    %c24_50 = arith.constant 24 : index
    %c80_51 = arith.constant 80 : index
    %52 = vector.load %arg11[%c24_50, %c80_51] : memref<72x160xbf16, #tpu.memory_space<vmem>>, vector<8x80xbf16>
    tpu.vector_store %arg11[%c24_50, %c80_51], %51 {strides = array<i32>} : memref<72x160xbf16, #tpu.memory_space<vmem>>, vector<8x80xbf16>,
    %c0_52 = arith.constant 0 : index
    %c113_53 = arith.constant 113 : index
    %53 = vector.load %arg10[%c0_52, %c113_53] : memref<8x204xbf16, #tpu.memory_space<vmem>>, vector<8x80xbf16>
    %c32_54 = arith.constant 32 : index
    %c80_55 = arith.constant 80 : index
    %54 = vector.load %arg11[%c32_54, %c80_55] : memref<72x160xbf16, #tpu.memory_space<vmem>>, vector<8x80xbf16>
    tpu.vector_store %arg11[%c32_54, %c80_55], %53 {strides = array<i32>} : memref<72x160xbf16, #tpu.memory_space<vmem>>, vector<8x80xbf16>,
    %c0_56 = arith.constant 0 : index
    %c114 = arith.constant 114 : index
    %55 = vector.load %arg10[%c0_56, %c114] : memref<8x204xbf16, #tpu.memory_space<vmem>>, vector<8x80xbf16>
    %c40_57 = arith.constant 40 : index
    %c80_58 = arith.constant 80 : index
    %56 = vector.load %arg11[%c40_57, %c80_58] : memref<72x160xbf16, #tpu.memory_space<vmem>>, vector<8x80xbf16>
    tpu.vector_store %arg11[%c40_57, %c80_58], %55 {strides = array<i32>} : memref<72x160xbf16, #tpu.memory_space<vmem>>, vector<8x80xbf16>,
    %c0_59 = arith.constant 0 : index
    %c122 = arith.constant 122 : index
    %57 = vector.load %arg10[%c0_59, %c122] : memref<8x204xbf16, #tpu.memory_space<vmem>>, vector<8x80xbf16>
    %c48_60 = arith.constant 48 : index
    %c80_61 = arith.constant 80 : index
    %58 = vector.load %arg11[%c48_60, %c80_61] : memref<72x160xbf16, #tpu.memory_space<vmem>>, vector<8x80xbf16>
    tpu.vector_store %arg11[%c48_60, %c80_61], %57 {strides = array<i32>} : memref<72x160xbf16, #tpu.memory_space<vmem>>, vector<8x80xbf16>,
    %c0_62 = arith.constant 0 : index
    %c123 = arith.constant 123 : index
    %59 = vector.load %arg10[%c0_62, %c123] : memref<8x204xbf16, #tpu.memory_space<vmem>>, vector<8x80xbf16>
    %c56_63 = arith.constant 56 : index
    %c80_64 = arith.constant 80 : index
    %60 = vector.load %arg11[%c56_63, %c80_64] : memref<72x160xbf16, #tpu.memory_space<vmem>>, vector<8x80xbf16>
    tpu.vector_store %arg11[%c56_63, %c80_64], %59 {strides = array<i32>} : memref<72x160xbf16, #tpu.memory_space<vmem>>, vector<8x80xbf16>,
    %c0_65 = arith.constant 0 : index
    %c124 = arith.constant 124 : index
    %61 = vector.load %arg10[%c0_65, %c124] : memref<8x204xbf16, #tpu.memory_space<vmem>>, vector<8x80xbf16>
    %c64_66 = arith.constant 64 : index
    %c80_67 = arith.constant 80 : index
    %62 = vector.load %arg11[%c64_66, %c80_67] : memref<72x160xbf16, #tpu.memory_space<vmem>>, vector<8x80xbf16>
    tpu.vector_store %arg11[%c64_66, %c80_67], %61 {strides = array<i32>} : memref<72x160xbf16, #tpu.memory_space<vmem>>, vector<8x80xbf16>,
    %c0_68 = arith.constant 0 : index
    %c0_69 = arith.constant 0 : index
    %63 = vector.load %arg5[%c0_68, %c0_69] : memref<8x72xbf16, #tpu.memory_space<vmem>>, vector<8x72xbf16>
    %c0_70 = arith.constant 0 : index
    %c0_71 = arith.constant 0 : index
    %64 = vector.load %arg11[%c0_70, %c0_71] : memref<72x160xbf16, #tpu.memory_space<vmem>>, vector<72x160xbf16>
    %cst_72 = arith.constant dense<0.000000e+00> : vector<8x160xf32>
    %65 = tpu.matmul %63, %64, %cst_72 {dimension_numbers = #tpu.dot_dimension_numbers<[1], [0], [0], [1], [0, 0, 1, 1], [], []>} : vector<8x72xbf16>, vector<72x160xbf16>, vector<8x160xf32> -> vector<8x160xf32>
    %66 = arith.truncf %65 : vector<8x160xf32> to vector<8x160xbf16>
    %c0_73 = arith.constant 0 : index
    %c0_74 = arith.constant 0 : index
    %c0_75 = arith.constant 0 : index
    %67 = vector.load %arg7[%c0_73, %c0_74, %c0_75] : memref<1x8x160xbf16, #tpu.memory_space<vmem>>, vector<1x8x160xbf16>
    %68 = vector.shape_cast %67 : vector<1x8x160xbf16> to vector<8x160xbf16>
    %69 = vector.shape_cast %66 : vector<8x160xbf16> to vector<1x8x160xbf16>
    tpu.vector_store %arg7[%c0_73, %c0_74, %c0_75], %69 {strides = array<i32>} : memref<1x8x160xbf16, #tpu.memory_space<vmem>>, vector<1x8x160xbf16>,
    %c0_76 = arith.constant 0 : index
    %c0_77 = arith.constant 0 : index
    %70 = vector.load %arg4[%c0_76, %c0_77] : memref<1x160xf32, #tpu.memory_space<vmem>>, vector<1x160xf32>
    %71 = vector.broadcast %70 : vector<1x160xf32> to vector<8x160xf32>
    %72 = arith.mulf %65, %71 : vector<8x160xf32>
    %cst_78 = arith.constant dense<0.000000e+00> : vector<8xf32>
    %73 = vector.multi_reduction <add>, %72, %cst_78 [1] : vector<8x160xf32> to vector<8xf32>
    %74 = vector.shape_cast %73 : vector<8xf32> to vector<8x1xf32>
    %c0_79 = arith.constant 0 : index
    %c0_80 = arith.constant 0 : index
    %c0_81 = arith.constant 0 : index
    %75 = vector.load %arg8[%c0_79, %c0_80, %c0_81] : memref<1x8x1xf32, #tpu.memory_space<vmem>>, vector<1x8x1xf32>
    %76 = vector.shape_cast %75 : vector<1x8x1xf32> to vector<8x1xf32>
    %77 = vector.shape_cast %74 : vector<8x1xf32> to vector<1x8x1xf32>
    tpu.vector_store %arg8[%c0_79, %c0_80, %c0_81], %77 {strides = array<i32>} : memref<1x8x1xf32, #tpu.memory_space<vmem>>, vector<1x8x1xf32>,
    %78 = arith.mulf %72, %65 : vector<8x160xf32>
    %cst_82 = arith.constant dense<0.000000e+00> : vector<8xf32>
    %79 = vector.multi_reduction <add>, %78, %cst_82 [1] : vector<8x160xf32> to vector<8xf32>
    %80 = vector.shape_cast %79 : vector<8xf32> to vector<8x1xf32>
    %c0_83 = arith.constant 0 : index
    %c0_84 = arith.constant 0 : index
    %c0_85 = arith.constant 0 : index
    %81 = vector.load %arg9[%c0_83, %c0_84, %c0_85] : memref<1x8x1xf32, #tpu.memory_space<vmem>>, vector<1x8x1xf32>
    %82 = vector.shape_cast %81 : vector<1x8x1xf32> to vector<8x1xf32>
    %83 = vector.shape_cast %80 : vector<8x1xf32> to vector<1x8x1xf32>
    tpu.vector_store %arg9[%c0_83, %c0_84, %c0_85], %83 {strides = array<i32>} : memref<1x8x1xf32, #tpu.memory_space<vmem>>, vector<1x8x1xf32>,
    return
  }
  func.func @transform_0(%arg0: i32) -> (i32, i32, i32) {
    %c0_i32 = arith.constant 0 : i32
    %c0_i32_0 = arith.constant 0 : i32
    %c0_i32_1 = arith.constant 0 : i32
    return %arg0, %c0_i32, %c0_i32_0 : i32, i32, i32
  }
  func.func @transform_1(%arg0: i32) -> (i32, i32) {
    %c0_i32 = arith.constant 0 : i32
    %c0_i32_0 = arith.constant 0 : i32
    %c0_i32_1 = arith.constant 0 : i32
    return %c0_i32, %c0_i32_0 : i32, i32
  }
  func.func @transform_2(%arg0: i32) -> (i32, i32) {
    %c0_i32 = arith.constant 0 : i32
    %c0_i32_0 = arith.constant 0 : i32
    %c0_i32_1 = arith.constant 0 : i32
    return %c0_i32, %c0_i32_0 : i32, i32
  }
  func.func @transform_3(%arg0: i32) -> (i32, i32) {
    %c0_i32 = arith.constant 0 : i32
    %c0_i32_0 = arith.constant 0 : i32
    %c0_i32_1 = arith.constant 0 : i32
    return %c0_i32, %c0_i32_0 : i32, i32
  }
  func.func @transform_4(%arg0: i32) -> (i32, i32) {
    %c0_i32 = arith.constant 0 : i32
    %c0_i32_0 = arith.constant 0 : i32
    %c0_i32_1 = arith.constant 0 : i32
    return %c0_i32, %c0_i32_0 : i32, i32
  }
  func.func @transform_5(%arg0: i32) -> (i32, i32, i32) {
    %c0_i32 = arith.constant 0 : i32
    %c0_i32_0 = arith.constant 0 : i32
    %c0_i32_1 = arith.constant 0 : i32
    return %arg0, %c0_i32, %c0_i32_0 : i32, i32, i32
  }
  func.func @transform_6(%arg0: i32) -> (i32, i32, i32) {
    %c0_i32 = arith.constant 0 : i32
    %c0_i32_0 = arith.constant 0 : i32
    %c0_i32_1 = arith.constant 0 : i32
    return %arg0, %c0_i32, %c0_i32_0 : i32, i32, i32
  }
  func.func @transform_7(%arg0: i32) -> (i32, i32, i32) {
    %c0_i32 = arith.constant 0 : i32
    %c0_i32_0 = arith.constant 0 : i32
    %c0_i32_1 = arith.constant 0 : i32
    return %arg0, %c0_i32, %c0_i32_0 : i32, i32, i32
  }
  func.func @transform_8(%arg0: i32) -> (i32, i32, i32) {
    %c0_i32 = arith.constant 0 : i32
    %c0_i32_0 = arith.constant 0 : i32
    %c0_i32_1 = arith.constant 0 : i32
    return %arg0, %c0_i32, %c0_i32_0 : i32, i32, i32
  }
}

module attributes {stable_mosaic.version = 11 : i64} {
  func.func @_bn_residual_relu_kernel(%arg0: i32, %arg1: memref<1x8x160xbf16, #tpu.memory_space<vmem>>, %arg2: memref<8x1xf32, #tpu.memory_space<vmem>>, %arg3: memref<8x1xf32, #tpu.memory_space<vmem>>, %arg4: memref<1x8x160xbf16, #tpu.memory_space<vmem>>, %arg5: memref<8x1xf32, #tpu.memory_space<vmem>>, %arg6: memref<8x1xf32, #tpu.memory_space<vmem>>, %arg7: memref<1x8x160xf32, #tpu.memory_space<vmem>>, %arg8: memref<1x8x160xf32, #tpu.memory_space<vmem>>) attributes {dimension_semantics = [#tpu.dimension_semantics<parallel>], iteration_bounds = array<i64: 1>, scalar_prefetch = 0 : i64, scratch_operands = 0 : i64, tpu.core_type = #tpu.core_type<tc>, window_params = [{transform_indices = @transform_0, window_bounds = array<i64: 1, 8, 160>}, {pipeline_mode = #tpu.pipeline_mode<synchronous>, transform_indices = @transform_1, window_bounds = array<i64: 8, 1>}, {pipeline_mode = #tpu.pipeline_mode<synchronous>, transform_indices = @transform_2, window_bounds = array<i64: 8, 1>}, {transform_indices = @transform_3, window_bounds = array<i64: 1, 8, 160>}, {pipeline_mode = #tpu.pipeline_mode<synchronous>, transform_indices = @transform_4, window_bounds = array<i64: 8, 1>}, {pipeline_mode = #tpu.pipeline_mode<synchronous>, transform_indices = @transform_5, window_bounds = array<i64: 8, 1>}, {transform_indices = @transform_6, window_bounds = array<i64: 1, 8, 160>}, {transform_indices = @transform_7, window_bounds = array<i64: 1, 8, 160>}]} {
    %c0 = arith.constant 0 : index
    %c0_0 = arith.constant 0 : index
    %c0_1 = arith.constant 0 : index
    %0 = vector.load %arg1[%c0, %c0_0, %c0_1] : memref<1x8x160xbf16, #tpu.memory_space<vmem>>, vector<1x8x160xbf16>
    %1 = vector.shape_cast %0 : vector<1x8x160xbf16> to vector<8x160xbf16>
    %2 = arith.extf %1 : vector<8x160xbf16> to vector<8x160xf32>
    %c0_2 = arith.constant 0 : index
    %c0_3 = arith.constant 0 : index
    %3 = vector.load %arg2[%c0_2, %c0_3] : memref<8x1xf32, #tpu.memory_space<vmem>>, vector<8x1xf32>
    %4 = vector.broadcast %3 : vector<8x1xf32> to vector<8x160xf32>
    %5 = arith.mulf %2, %4 : vector<8x160xf32>
    %c0_4 = arith.constant 0 : index
    %c0_5 = arith.constant 0 : index
    %6 = vector.load %arg3[%c0_4, %c0_5] : memref<8x1xf32, #tpu.memory_space<vmem>>, vector<8x1xf32>
    %7 = vector.broadcast %6 : vector<8x1xf32> to vector<8x160xf32>
    %8 = arith.addf %5, %7 : vector<8x160xf32>
    %c0_6 = arith.constant 0 : index
    %c0_7 = arith.constant 0 : index
    %c0_8 = arith.constant 0 : index
    %9 = vector.load %arg4[%c0_6, %c0_7, %c0_8] : memref<1x8x160xbf16, #tpu.memory_space<vmem>>, vector<1x8x160xbf16>
    %10 = vector.shape_cast %9 : vector<1x8x160xbf16> to vector<8x160xbf16>
    %11 = arith.extf %10 : vector<8x160xbf16> to vector<8x160xf32>
    %c0_9 = arith.constant 0 : index
    %c0_10 = arith.constant 0 : index
    %12 = vector.load %arg5[%c0_9, %c0_10] : memref<8x1xf32, #tpu.memory_space<vmem>>, vector<8x1xf32>
    %13 = vector.broadcast %12 : vector<8x1xf32> to vector<8x160xf32>
    %14 = arith.mulf %11, %13 : vector<8x160xf32>
    %c0_11 = arith.constant 0 : index
    %c0_12 = arith.constant 0 : index
    %15 = vector.load %arg6[%c0_11, %c0_12] : memref<8x1xf32, #tpu.memory_space<vmem>>, vector<8x1xf32>
    %16 = vector.broadcast %15 : vector<8x1xf32> to vector<8x160xf32>
    %17 = arith.addf %14, %16 : vector<8x160xf32>
    %c0_13 = arith.constant 0 : index
    %c0_14 = arith.constant 0 : index
    %c0_15 = arith.constant 0 : index
    %18 = vector.load %arg7[%c0_13, %c0_14, %c0_15] : memref<1x8x160xf32, #tpu.memory_space<vmem>>, vector<1x8x160xf32>
    %19 = vector.shape_cast %18 : vector<1x8x160xf32> to vector<8x160xf32>
    %20 = vector.shape_cast %8 : vector<8x160xf32> to vector<1x8x160xf32>
    tpu.vector_store %arg7[%c0_13, %c0_14, %c0_15], %20 {strides = array<i32>} : memref<1x8x160xf32, #tpu.memory_space<vmem>>, vector<1x8x160xf32>,
    %21 = arith.addf %8, %17 : vector<8x160xf32>
    %cst = arith.constant 0.000000e+00 : f32
    %22 = vector.broadcast %cst : f32 to vector<8x160xf32>
    %23 = arith.maximumf %21, %22 : vector<8x160xf32>
    %c0_16 = arith.constant 0 : index
    %c0_17 = arith.constant 0 : index
    %c0_18 = arith.constant 0 : index
    %24 = vector.load %arg8[%c0_16, %c0_17, %c0_18] : memref<1x8x160xf32, #tpu.memory_space<vmem>>, vector<1x8x160xf32>
    %25 = vector.shape_cast %24 : vector<1x8x160xf32> to vector<8x160xf32>
    %26 = vector.shape_cast %23 : vector<8x160xf32> to vector<1x8x160xf32>
    tpu.vector_store %arg8[%c0_16, %c0_17, %c0_18], %26 {strides = array<i32>} : memref<1x8x160xf32, #tpu.memory_space<vmem>>, vector<1x8x160xf32>,
    return
  }
  func.func @transform_0(%arg0: i32) -> (i32, i32, i32) {
    %c0_i32 = arith.constant 0 : i32
    %c0_i32_0 = arith.constant 0 : i32
    %c0_i32_1 = arith.constant 0 : i32
    return %arg0, %c0_i32, %c0_i32_0 : i32, i32, i32
  }
  func.func @transform_1(%arg0: i32) -> (i32, i32) {
    %c0_i32 = arith.constant 0 : i32
    %c0_i32_0 = arith.constant 0 : i32
    %c0_i32_1 = arith.constant 0 : i32
    return %c0_i32, %c0_i32_0 : i32, i32
  }
  func.func @transform_2(%arg0: i32) -> (i32, i32) {
    %c0_i32 = arith.constant 0 : i32
    %c0_i32_0 = arith.constant 0 : i32
    %c0_i32_1 = arith.constant 0 : i32
    return %c0_i32, %c0_i32_0 : i32, i32
  }
  func.func @transform_3(%arg0: i32) -> (i32, i32, i32) {
    %c0_i32 = arith.constant 0 : i32
    %c0_i32_0 = arith.constant 0 : i32
    %c0_i32_1 = arith.constant 0 : i32
    return %arg0, %c0_i32, %c0_i32_0 : i32, i32, i32
  }
  func.func @transform_4(%arg0: i32) -> (i32, i32) {
    %c0_i32 = arith.constant 0 : i32
    %c0_i32_0 = arith.constant 0 : i32
    %c0_i32_1 = arith.constant 0 : i32
    return %c0_i32, %c0_i32_0 : i32, i32
  }
  func.func @transform_5(%arg0: i32) -> (i32, i32) {
    %c0_i32 = arith.constant 0 : i32
    %c0_i32_0 = arith.constant 0 : i32
    %c0_i32_1 = arith.constant 0 : i32
    return %c0_i32, %c0_i32_0 : i32, i32
  }
  func.func @transform_6(%arg0: i32) -> (i32, i32, i32) {
    %c0_i32 = arith.constant 0 : i32
    %c0_i32_0 = arith.constant 0 : i32
    %c0_i32_1 = arith.constant 0 : i32
    return %arg0, %c0_i32, %c0_i32_0 : i32, i32, i32
  }
  func.func @transform_7(%arg0: i32) -> (i32, i32, i32) {
    %c0_i32 = arith.constant 0 : i32
    %c0_i32_0 = arith.constant 0 : i32
    %c0_i32_1 = arith.constant 0 : i32
    return %arg0, %c0_i32, %c0_i32_0 : i32, i32, i32
  }
}

</mosaic_0001>

<bundles_post_ra>
// kernel: tile.12
= control target key start
LH: loop header
LB: loop body
LE: loop exit
PB: predicated region body
PF: predicated region fallthrough
CT: control target
= control target key end

     0   :  { %s22_s0 = inlined_call_operand.vmem [shape: f32[10], index: 0, kind: input, shape index: {}]   ;;  %s23_s1 = inlined_call_operand.vmem [shape: f32[8,10], index: 1, kind: output, shape index: {}]  }
   0x1   :  { %v4_v0 = vld [vmem:[%s22_s0] ss:$0 sm:$0xff] }
   0x2   :  { %5 = vst [vmem:[%s23_s1] sm:$0xff] %v4_v0 }

// kernel: basic_block_forward.6
= control target key start
LH: loop header
LB: loop body
LE: loop exit
PB: predicated region body
PF: predicated region fallthrough
CT: control target
= control target key end

     0   :  { %vm29_vm0 = vcmask 1043456   ;;  %v137_v1 = vmov 0   ;;  %vm25_vm1 = vcmask 64512   ;;  %v90_v6 = vlaneseq  ;;  %s189_s0 = inlined_call_operand.vmem [shape: bf16[1,8,160], index: 0, kind: input, shape index: {}]   ;;  %s190_s1 = inlined_call_operand.vmem [shape: bf16[8,8], index: 1, kind: input, shape index: {}]   ;;  %s191_s2 = inlined_call_operand.vmem [shape: f32[1,160], index: 2, kind: input, shape index: {}]   ;;  %s192_s3 = inlined_call_operand.vmem [shape: bf16[1,8,160], index: 3, kind: output, shape index: {0}]   ;;  %s193_s4 = inlined_call_operand.vmem [shape: f32[1,8,1], index: 4, kind: output, shape index: {1}]   ;;  %s194_s5 = inlined_call_operand.vmem [shape: f32[1,8,1], index: 5, kind: output, shape index: {2}]  }
   0x1   :  { %v19_v0 = vld [vmem:[%s189_s0] sm:$0xff]  ;;  %68 = vmatprep.mubr.bf16.mxu0 %v137_v1  ;;  %vm85_vm2 = vcmask 261124   ;;  %vm102_vm4 = vcmask 261120   ;;  %vm107_vm5 = vcmask 7168  }
   0x2   :  { %v129_v2 = vcombine.high %v19_v0, %v19_v0  ;;  %v128_v3 = vcombine.low %v19_v0, %v19_v0  ;;  %v18_v5 = vld [vmem:[%s190_s1] sm:$0xf]  ;;  %v91_v7 = vshrl.u32 %v90_v6, 7  ;;  %vm86_vm3 = vmor %vm85_vm2, %vm29_vm0 }
   0x3   :  { %v88_v10 = vld [vmem:[%s191_s2] sm:$0x3] }
   0x4   :  { %130 = vmatprep.subr.msk.bf16.mxu0 %vm29_vm0, %v129_v2  ;;  %v31_v4 = vsel %vm29_vm0, %v128_v3, 0  ;;  %v96_v8 = vsub.s32 1, %v91_v7  ;;  %v92_v9 = vsub.s32 0, %v91_v7 }
   0x5   :  { %51 = vmatpush1.bf16.msra.mxu0 %v31_v4 }
   0x6   :  { %v97_v11 = vrot.slane %v88_v10, %v96_v8  ;;  %v93_v13 = vrot.slane %v88_v10, %v92_v9 }
   0x8   :  { %131 = vmatmul.mubr.msk.bf16.vlgmr.msra.gmra.mxu0 %vm25_vm1, %v18_v5 }
  0xc8   :  { %v70_v12 = vpop.f32.mrf.mxu0 }
  0xc9   :  { %v100_v18 = vmul.f32 %v93_v13, %v70_v12 }
  0xca   :  { %v72_v14 = vpop.f32.mrf.mxu0 }
  0xcb   :  { %v133_v15 = vpack.c.bf16 %v72_v14, %v70_v12  ;;  %v101_v16 = vmul.f32 %v97_v11, %v72_v14  ;;  %v109_v24 = vmul.f32 %v100_v18, %v70_v12 }
  0xcc   :  { %v74_v17 = vpop.f32.mrf.mxu0 }
  0xcd   :  { %87 = vst.msk [vmem:[%s192_s3] sm:$0xff] %vm86_vm3, %v133_v15  ;;  %v103_v19 = vsel %vm102_vm4, %v101_v16, 0.0  ;;  %v110_v20 = vmul.f32 %v101_v16, %v72_v14 }
  0xce   :  { %v75_v21 = vpop.f32.mrf.mxu0  ;;  %v104_v22 = vadd.f32 %v103_v19, %v100_v18 }
  0xcf   :  { %v111_v23 = vsel %vm102_vm4, %v110_v20, 0.0 }
  0xd0   :  { %105 = vadd.xlane.f32.xlu0 %v104_v22  ;;  %v112_v25 = vadd.f32 %v111_v23, %v109_v24 }
  0xd4   :  { %113 = vadd.xlane.f32.xlu0 %v112_v25 }
 0x159   :  { %v106_v26 = vpop.xlane.xlu0 %105 }
 0x15a   :  { %108 = vst.msk [vmem:[%s193_s4] sm:$0xff] %vm107_vm5, %v106_v26 }
 0x15d   :  { %v114_v27 = vpop.xlane.xlu0 %113 }
 0x15e   :  { %115 = vst.msk [vmem:[%s194_s5] sm:$0xff] %vm107_vm5, %v114_v27 }

// kernel: basic_block_forward.4
= control target key start
LH: loop header
LB: loop body
LE: loop exit
PB: predicated region body
PF: predicated region fallthrough
CT: control target
= control target key end

     0   :  { %s326_s20 = smov 106   ;;  %s327_s21 = smov 107   ;;  %vm19_vm0 = vcmask 650240   ;;  %v332_v13 = vmov 0   ;;  %vm65_vm1 = vcmask 1044096   ;;  %vm66_vm2 = vcmask 261124   ;;  %s459_s0 = inlined_call_operand.vmem [shape: bf16[1,32,182], index: 0, kind: input, shape index: {}]   ;;  %s460_s1 = inlined_call_operand.vmem [shape: bf16[8,72], index: 1, kind: input, shape index: {}]   ;;  %s461_s2 = inlined_call_operand.vmem [shape: f32[1,160], index: 2, kind: input, shape index: {}]   ;;  %s462_s3 = inlined_call_operand.vmem [shape: bf16[1,8,160], index: 3, kind: output, shape index: {0}]   ;;  %s463_s4 = inlined_call_operand.vmem [shape: f32[1,8,1], index: 4, kind: output, shape index: {1}]   ;;  %s464_s5 = inlined_call_operand.vmem [shape: f32[1,8,1], index: 5, kind: output, shape index: {2}]  }
   0x1   :  { %v127_v0 = vld [vmem:[%s459_s0] sm:$0xff]  ;;  %v119_v1 = vld [vmem:[%s459_s0 + $0x8] sm:$0xff]  ;;  %v31_v3 = vld [vmem:[%s459_s0 + $0x18] sm:$0xf]  ;;  %s328_s28 = smov 117   ;;  %s329_s10 = smov 118   ;;  %234 = vmatprep.mubr.bf16.mxu0 %v332_v13  ;;  %v255_v62 = vlaneseq }
   0x2   :  { %129 = vrot.lane.b32.xlu0 %v127_v0, %s326_s20  ;;  %112 = vrot.lane.b32.xlu1 %v127_v0, %s327_s21  ;;  %v51_v2 = vld [vmem:[%s459_s0] sm:$0xf]  ;;  %32 = vst.msk [vmem:[#allocation2 + $0x20] sm:$0xf] %vm19_vm0, %v31_v3  ;;  %v45_v4 = vld [vmem:[%s459_s0 + $0x8] sm:$0xf]  ;;  %vm407_vm4 = vmor %vm66_vm2, %vm65_vm1 }
   0x3   :  { %v39_v5 = vld [vmem:[%s459_s0] sm:$0xf]  ;;  %v29_v6 = vld [vmem:[%s459_s0 + $0x10] sm:$0xf]  ;;  %v94_v8 = vld [vmem:[%s459_s0 + $0x18] sm:$0xff]  ;;  %s330_s17 = smov 116  }
   0x4   :  { %30 = vst.msk [vmem:[#allocation2 + $0x18] sm:$0xf] %vm19_vm0, %v29_v6  ;;  %v102_v7 = vld [vmem:[%s459_s0 + $0x10] sm:$0xff]  ;;  %v18_v9 = vld [vmem:[%s459_s0] sm:$0xf]  ;;  %s331_s22 = smov 127  }
   0x5   :  { %20 = vst.msk [vmem:[#allocation2] sm:$0xf] %vm19_vm0, %v18_v9  ;;  %v21_v10 = vld [vmem:[%s459_s0 + $0x8] sm:$0xf]  ;;  %v33_v11 = vld [vmem:[%s459_s0 + $0x10] sm:$0xf] }
   0x6   :  { %121 = vrot.lane.b32.xlu1 %v119_v1, %s327_s21  ;;  %53 = vrot.lane.b32.xlu0 %v51_v2, %s328_s28  ;;  %22 = vst.msk [vmem:[#allocation2 + $0x8] sm:$0xf] %vm19_vm0, %v21_v10  ;;  %v23_v12 = vld [vmem:[%s459_s0] sm:$0xf]  ;;  %vm132_vm3 = vcmask 867328   ;;  %vm115_vm5 = vcmask 875520  }
   0x7   :  { %vm62_vm6 = vcmask 957440   ;;  %vm195_vm7 = vcmask 1043456   ;;  %vm82_vm8 = vcmask 949248   ;;  %v136_v61 = vld [vmem:[%s460_s1] sm:$0xf]  ;;  %vm191_vm9 = vcmask 588800  }
   0x8   :  { %v256_v63 = vshrl.u32 %v255_v62, 7  ;;  %vm251_vm10 = vmor %vm66_vm2, %vm195_vm7  ;;  %vm267_vm11 = vcmask 261120   ;;  %vm272_vm12 = vcmask 7168  }
   0xa   :  { %47 = vrot.lane.b32.xlu1 %v45_v4, %s329_s10  ;;  %41 = vrot.lane.b32.xlu0 %v39_v5, %s329_s10  ;;  %v261_v2 = vsub.s32 1, %v256_v63 }
   0xe   :  { %104 = vrot.lane.b32.xlu1 %v102_v7, %s330_s17  ;;  %96 = vrot.lane.b32.xlu0 %v94_v8, %s328_s28 }
  0x12   :  { %79 = vrot.lane.b32.xlu1 %v127_v0, %s330_s17  ;;  %35 = vrot.lane.b32.xlu0 %v33_v11, %s331_s22 }
  0x16   :  { %88 = vrot.lane.b32.xlu0 %v102_v7, %s328_s28  ;;  %25 = vrot.lane.b32.xlu1 %v23_v12, %s331_s22 }
  0x1a   :  { %59 = vrot.lane.b32.xlu0 %v127_v0, %s328_s28  ;;  %71 = vrot.lane.b32.xlu1 %v119_v1, %s328_s28  ;;  %v257_v0 = vsub.s32 0, %v256_v63  ;;  %v253_v1 = vld [vmem:[%s461_s2] sm:$0x3] }
  0x1b   :  { %v262_v4 = vrot.slane %v253_v1, %v261_v2 }
  0x1c   :  { %v258_v3 = vrot.slane %v253_v1, %v257_v0 }
  0x74   :  { %v130_v14 = vpop.permute.xlu0 %129  ;;  %v113_v15 = vpop.permute.xlu1 %112 }
  0x75   :  { %v131_v16 = vrot.slane %v130_v14, 4  ;;  %v114_v21 = vrot.slane %v113_v15, 4 }
  0x77   :  { %v133_v20 = vsel %vm132_vm3, %v130_v14, %v131_v16  ;;  %v116_v25 = vsel %vm115_vm5, %v113_v15, %v114_v21 }
  0x78   :  { %v122_v18 = vpop.permute.xlu1 %121  ;;  %v54_v19 = vpop.permute.xlu0 %53 }
  0x79   :  { %v123_v22 = vrot.slane %v122_v18, 4  ;;  %56 = vst.msk [vmem:[#allocation2 + $0x40] sm:$0xf] %vm19_vm0, %v54_v19 }
  0x7a   :  { %135 = vst.msk [vmem:[#allocation2 + $0x40] sm:$0xff] %vm407_vm4, %v133_v20 }
  0x7b   :  { %v124_v26 = vsel %vm115_vm5, %v122_v18, %v123_v22 }
  0x7c   :  { %v48_v23 = vpop.permute.xlu1 %47  ;;  %v42_v24 = vpop.permute.xlu0 %41 }
  0x7d   :  { %50 = vst.msk [vmem:[#allocation2 + $0x38] sm:$0xf] %vm19_vm0, %v48_v23  ;;  %44 = vst.msk [vmem:[#allocation2 + $0x30] sm:$0xf] %vm19_vm0, %v42_v24 }
  0x7e   :  { %126 = vst.msk [vmem:[#allocation2 + $0x38] sm:$0xff] %vm407_vm4, %v124_v26  ;;  %118 = vst.msk [vmem:[#allocation2 + $0x30] sm:$0xff] %vm407_vm4, %v116_v25 }
  0x80   :  { %v105_v27 = vpop.permute.xlu1 %104  ;;  %v97_v28 = vpop.permute.xlu0 %96 }
  0x81   :  { %v106_v29 = vrot.slane %v105_v27, 4  ;;  %v98_v30 = vrot.slane %v97_v28, 4  ;;  %v145_v31 = vld [vmem:[#allocation2 + $0x40] sm:$0xff] }
  0x82   :  { %v302_v32 = vcombine.high %v145_v31, %v145_v31  ;;  %v301_v33 = vcombine.low %v145_v31, %v145_v31 }
  0x83   :  { %v99_v34 = vsel %vm62_vm6, %v97_v28, %v98_v30  ;;  %v107_v38 = vsel %vm82_vm8, %v105_v27, %v106_v29 }
  0x84   :  { %101 = vst.msk [vmem:[#allocation2 + $0x20] sm:$0xff] %vm407_vm4, %v99_v34  ;;  %303 = vmatprep.subr.msk.bf16.mxu0 %vm195_vm7, %v302_v32  ;;  %v80_v35 = vpop.permute.xlu1 %79  ;;  %v36_v36 = vpop.permute.xlu0 %35  ;;  %v197_v37 = vsel %vm195_vm7, %v301_v33, 0 }
  0x85   :  { %v81_v39 = vrot.slane %v80_v35, 4  ;;  %38 = vst.msk [vmem:[#allocation2 + $0x28] sm:$0xf] %vm19_vm0, %v36_v36  ;;  %209 = vmatpush1.bf16.msra.mxu0 %v197_v37  ;;  %v143_v40 = vld [vmem:[#allocation2 + $0x30] sm:$0xff]  ;;  %v144_v41 = vld [vmem:[#allocation2 + $0x38] sm:$0xff] }
  0x86   :  { %v315_v42 = vld [vmem:[#allocation2 + $0x34] ss:$8 sps:$4 sm:$0xff]   ;;  %109 = vst.msk [vmem:[#allocation2 + $0x28] sm:$0xff] %vm407_vm4, %v107_v38  ;;  %v299_v43 = vcombine.low %v143_v40, %v144_v41 }
  0x87   :  { %210 = vmatprep.subr.bf16.mxu0 %v315_v42  ;;  %v83_v46 = vsel %vm82_vm8, %v80_v35, %v81_v39 }
  0x88   :  { %v89_v44 = vpop.permute.xlu0 %88  ;;  %v26_v45 = vpop.permute.xlu1 %25 }
  0x89   :  { %v90_v47 = vrot.slane %v89_v44, 4  ;;  %28 = vst.msk [vmem:[#allocation2 + $0x10] sm:$0xf] %vm19_vm0, %v26_v45  ;;  %211 = vmatpush1.bf16.msra.mxu0 %v299_v43 }
  0x8a   :  { %85 = vst.msk [vmem:[#allocation2 + $0x10] sm:$0xff] %vm407_vm4, %v83_v46 }
  0x8b   :  { %v91_v48 = vsel %vm62_vm6, %v89_v44, %v90_v47 }
  0x8c   :  { %93 = vst.msk [vmem:[#allocation2 + $0x18] sm:$0xff] %vm407_vm4, %v91_v48  ;;  %v60_v49 = vpop.permute.xlu0 %59  ;;  %v72_v50 = vpop.permute.xlu1 %71 }
  0x8d   :  { %v61_v51 = vrot.slane %v60_v49, 4  ;;  %v73_v52 = vrot.slane %v72_v50, 4  ;;  %v317_v53 = vld [vmem:[#allocation2 + $0x24] ss:$8 sps:$4 sm:$0xff]   ;;  %v319_v54 = vld [vmem:[#allocation2 + $0x20] ss:$8 sps:$4 sm:$0xff]  }
  0x8e   :  { %212 = vmatprep.subr.bf16.mxu0 %v317_v53 }
  0x8f   :  { %v63_v55 = vsel %vm62_vm6, %v60_v49, %v61_v51  ;;  %v74_v56 = vsel %vm62_vm6, %v72_v50, %v73_v52  ;;  %213 = vmatpush1.bf16.msra.mxu0 %v319_v54 }
  0x90   :  { %68 = vst.msk [vmem:[#allocation2] sm:$0xff] %vm407_vm4, %v63_v55  ;;  %76 = vst.msk [vmem:[#allocation2 + $0x8] sm:$0xff] %vm407_vm4, %v74_v56 }
  0x93   :  { %v320_v57 = vld [vmem:[#allocation2 + $0x14] ss:$8 sps:$4 sm:$0xff]   ;;  %v322_v58 = vld [vmem:[#allocation2 + $0x10] ss:$8 sps:$4 sm:$0xff]  }
  0x94   :  { %214 = vmatprep.subr.bf16.mxu0 %v320_v57 }
  0x95   :  { %215 = vmatpush1.bf16.msra.mxu0 %v322_v58 }
  0x97   :  { %v323_v59 = vld [vmem:[#allocation2 + $0x4] ss:$8 sps:$4 sm:$0xff]   ;;  %v325_v60 = vld [vmem:[#allocation2] ss:$8 sps:$4 sm:$0xff]  }
  0x98   :  { %216 = vmatprep.subr.bf16.mxu0 %v323_v59 }
  0x99   :  { %217 = vmatpush1.bf16.msra.mxu0 %v325_v60 }
  0x9c   :  { %304 = vmatmul.mubr.msk.bf16.vlgmr.msra.gmra.mxu0 %vm191_vm9, %v136_v61 }
 0x15c   :  { %v236_v5 = vpop.f32.mrf.mxu0 }
 0x15d   :  { %v265_v7 = vmul.f32 %v258_v3, %v236_v5 }
 0x15e   :  { %v238_v6 = vpop.f32.mrf.mxu0 }
 0x15f   :  { %v306_v8 = vpack.c.bf16 %v238_v6, %v236_v5  ;;  %v266_v9 = vmul.f32 %v262_v4, %v238_v6  ;;  %v274_v15 = vmul.f32 %v265_v7, %v236_v5 }
 0x160   :  { %v240_v10 = vpop.f32.mrf.mxu0 }
 0x161   :  { %252 = vst.msk [vmem:[%s462_s3] sm:$0xff] %vm251_vm10, %v306_v8  ;;  %v275_v11 = vmul.f32 %v266_v9, %v238_v6  ;;  %v268_v12 = vsel %vm267_vm11, %v266_v9, 0.0 }
 0x162   :  { %v241_v13 = vpop.f32.mrf.mxu0  ;;  %v269_v14 = vadd.f32 %v268_v12, %v265_v7 }
 0x163   :  { %v276_v16 = vsel %vm267_vm11, %v275_v11, 0.0 }
 0x164   :  { %270 = vadd.xlane.f32.xlu0 %v269_v14  ;;  %v277_v17 = vadd.f32 %v276_v16, %v274_v15 }
 0x166   :  { %278 = vadd.xlane.f32.xlu1 %v277_v17 }
 0x1ed   :  { %v271_v18 = vpop.xlane.xlu0 %270 }
 0x1ee   :  { %273 = vst.msk [vmem:[%s463_s4] sm:$0xff] %vm272_vm12, %v271_v18 }
 0x1ef   :  { %v279_v19 = vpop.xlane.xlu1 %278 }
 0x1f0   :  { %280 = vst.msk [vmem:[%s464_s5] sm:$0xff] %vm272_vm12, %v279_v19 }

// kernel: basic_block_forward.5
= control target key start
LH: loop header
LB: loop body
LE: loop exit
PB: predicated region body
PF: predicated region fallthrough
CT: control target
= control target key end

     0   :  { %v441_v0 = vmov 0   ;;  %vm72_vm0 = vcmask 84992   ;;  %v48_v3 = vlaneseq  ;;  %vm69_vm1 = vcmask 261124   ;;  %s443_s13 = smov 33   ;;  %s445_s14 = smov 106   ;;  %s608_s1 = inlined_call_operand.vmem [shape: f32[8,1], index: 1, kind: input, shape index: {}]   ;;  %s609_s2 = inlined_call_operand.vmem [shape: f32[8,1], index: 2, kind: input, shape index: {}]   ;;  %s610_s0 = inlined_call_operand.vmem [shape: bf16[1,8,160], index: 0, kind: input, shape index: {}]   ;;  %s611_s3 = inlined_call_operand.vmem [shape: f32[1,160], index: 3, kind: input, shape index: {}]   ;;  %s612_s5 = inlined_call_operand.vmem [shape: bf16[1,8,160], index: 5, kind: output, shape index: {0}]   ;;  %s613_s4 = inlined_call_operand.vmem [shape: bf16[8,72], index: 4, kind: input, shape index: {}]   ;;  %s614_s6 = inlined_call_operand.vmem [shape: bf16[1,8,160], index: 6, kind: output, shape index: {1}]   ;;  %s615_s7 = inlined_call_operand.vmem [shape: f32[1,8,1], index: 7, kind: output, shape index: {2}]   ;;  %s616_s8 = inlined_call_operand.vmem [shape: f32[1,8,1], index: 8, kind: output, shape index: {3}]  }
   0x1   :  { %426 = vset.pattern.permute.xlu0 %v441_v0  ;;  %v28_v1 = vld [vmem:[%s608_s1] sm:$0xff]  ;;  %327 = vmatprep.mubr.bf16.mxu0 %v441_v0  ;;  %73 = vst.msk [vmem:[#allocation2] sm:$0xf] %vm72_vm0, %v441_v0  ;;  %vm68_vm2 = vcmask 1043456   ;;  %vm78_vm4 = vcmask 740440   ;;  %vm80_vm5 = vcmask 831192  }
   0x2   :  { %31 = vperm.xlu0 %426, %v28_v1   ;;  %v36_v2 = vld [vmem:[%s609_s2] sm:$0xff]  ;;  %v517_v5 = vshrl.u32 %v48_v3, 7  ;;  %vm530_vm3 = vmor %vm69_vm1, %vm68_vm2  ;;  %vm141_vm6 = vcmask 1044360   ;;  %vm142_vm7 = vcmask 531460   ;;  %vm138_vm8 = vcmask 269312   ;;  %s446_s15 = smov 117  }
   0x3   :  { %v25_v4 = vld [vmem:[%s610_s0] sm:$0xff]  ;;  %s442_s0 = smov 11   ;;  %vm133_vm9 = vcmask 921392   ;;  %vm540_vm10 = vmor %vm142_vm7, %vm141_vm6  ;;  %vm145_vm11 = vcmask 617992   ;;  %vm83_vm12 = vcmask 650240   ;;  %s447_s16 = smov 107  }
   0x4   :  { %v26_v6 = vunpack.c.l.bf16 %v25_v4  ;;  %v27_v7 = vunpack.c.h.bf16 %v25_v4  ;;  %v54_v9 = vsub.s32 1, %v517_v5  ;;  %v50_v10 = vsub.s32 0, %v517_v5  ;;  %v46_v11 = vld [vmem:[%s611_s3] sm:$0x3]  ;;  %s448_s17 = smov 126   ;;  %s449_s18 = smov 116  }
   0x5   :  { %s450_s19 = smov 84   ;;  %s451_s20 = smov 118   ;;  %vm155_vm13 = vcmask 1044096   ;;  %vm226_vm14 = vcmask 687104   ;;  %vm208_vm0 = vcmask 703488   ;;  %vm172_vm6 = vcmask 850944  }
   0x6   :  { %39 = vperm.xlu0 %426, %v36_v2   ;;  %v55_v15 = vrot.slane %v46_v11, %v54_v9  ;;  %v51_v18 = vrot.slane %v46_v11, %v50_v10  ;;  %s452_s21 = smov 86   ;;  %s453_s22 = smov 85   ;;  %vm561_vm15 = vmor %vm69_vm1, %vm155_vm13  ;;  %vm190_vm1 = vcmask 777216   ;;  %vm181_vm7 = vcmask 785408   ;;  %v230_v29 = vld [vmem:[%s613_s4] sm:$0xf] }
   0x7   :  { %s454_s23 = smov 95   ;;  %s455_s24 = smov 94  }
   0x8   :  { %s456_s25 = smov 104   ;;  %s457_s26 = smov 96  }
   0x9   :  { %s458_s27 = smov 105   ;;  %s459_s28 = smov 127  }
  0x7d   :  { %v32_v8 = vpop.permute.xlu0 %31 }
  0x7e   :  { %v34_v12 = vmul.f32 %v32_v8, %v26_v6  ;;  %v35_v13 = vmul.f32 %v32_v8, %v27_v7 }
  0x81   :  { %v40_v14 = vpop.permute.xlu0 %39 }
  0x82   :  { %v42_v16 = vadd.f32 %v40_v14, %v34_v12  ;;  %v43_v17 = vadd.f32 %v40_v14, %v35_v13 }
  0x84   :  { %v44_v19 = vmax.f32 %v42_v16, 0.0  ;;  %v45_v20 = vmax.f32 %v43_v17, 0.0 }
  0x86   :  { %v59_v21 = vmul.f32 %v55_v15, %v45_v20  ;;  %v58_v22 = vmul.f32 %v51_v18, %v44_v19 }
  0x88   :  { %v405_v24 = vpack.c.bf16 %v58_v22, %v58_v22  ;;  %v404_v25 = vpack.c.bf16 %v59_v21, %v58_v22 }
  0x8a   :  { %75 = vrot.lane.b32.xlu1 %v405_v24, %s442_s0  ;;  %71 = vst.msk [vmem:[%s612_s5] sm:$0xff] %vm530_vm3, %v404_v25  ;;  %s444_s5 = smov 108  }
  0x8e   :  { %135 = vrot.lane.b32.xlu1 %v404_v25, %s443_s13 }
  0xfc   :  { %v76_v26 = vpop.permute.xlu1 %75 }
  0xfd   :  { %79 = vst.msk [vmem:[#allocation2] sm:$0xf] %vm78_vm4, %v76_v26  ;;  %vm217_vm4 = vcmask 695296  }
  0xfe   :  { %81 = vst.msk [vmem:[#allocation2] sm:$0xf] %vm80_vm5, %v441_v0  ;;  %vm199_vm5 = vcmask 769024  }
 0x100   :  { %v136_v27 = vpop.permute.xlu1 %135 }
 0x101   :  { %v137_v28 = vrot.slane %v136_v27, 4 }
 0x103   :  { %v139_v39 = vsel %vm138_vm8, %v137_v28, %v136_v27  ;;  %vm152_vm8 = vcmask 867328  }
 0x105   :  { %v82_v30 = vld [vmem:[#allocation2] sm:$0xf] }
 0x106   :  { %v85_v31 = vld [vmem:[#allocation2] sm:$0xf]  ;;  %84 = vst.msk [vmem:[#allocation3] sm:$0xf] %vm83_vm12, %v82_v30 }
 0x107   :  { %v115_v32 = vld [vmem:[#allocation2] sm:$0xf] }
 0x108   :  { %117 = vrot.lane.b32.xlu0 %v115_v32, %s444_s5  ;;  %v127_v33 = vld [vmem:[#allocation2] sm:$0xf] }
 0x109   :  { %v103_v34 = vld [vmem:[#allocation2] sm:$0xf]  ;;  %129 = vrot.lane.b32.xlu1 %v127_v33, %s445_s14 }
 0x10a   :  { %v121_v35 = vld [vmem:[#allocation2] sm:$0xf] }
 0x10b   :  { %v91_v36 = vld [vmem:[#allocation2] sm:$0xf] }
 0x10c   :  { %v109_v37 = vld [vmem:[#allocation2] sm:$0xf]  ;;  %105 = vrot.lane.b32.xlu0 %v103_v34, %s446_s15 }
 0x10d   :  { %v97_v38 = vld [vmem:[#allocation2] sm:$0xf]  ;;  %123 = vrot.lane.b32.xlu1 %v121_v35, %s447_s16 }
 0x10e   :  { %134 = vst.msk [vmem:[#allocation2] sm:$0xf] %vm133_vm9, %v441_v0  ;;  %vm163_vm9 = vcmask 859136   ;;  %v345_v30 = vld [vmem:[%s611_s3] sm:$0x3] }
 0x10f   :  { %144 = vst.msk [vmem:[#allocation2] sm:$0xff] %vm540_vm10, %v139_v39  ;;  %v354_v32 = vrot.slane %v345_v30, %v54_v9  ;;  %vm359_vm10 = vcmask 261120  }
 0x110   :  { %146 = vst.msk [vmem:[#allocation2 + $0x4] sm:$0xf] %vm145_vm11, %v441_v0  ;;  %93 = vrot.lane.b32.xlu0 %v91_v36, %s448_s17  ;;  %vm364_vm11 = vcmask 7168  }
 0x111   :  { %111 = vrot.lane.b32.xlu1 %v109_v37, %s449_s18 }
 0x115   :  { %99 = vrot.lane.b32.xlu1 %v97_v38, %s451_s20 }
 0x117   :  { %v221_v40 = vld [vmem:[#allocation2] sm:$0xff] }
 0x118   :  { %223 = vrot.lane.b32.xlu0 %v221_v40, %s450_s19 }
 0x119   :  { %214 = vrot.lane.b32.xlu1 %v221_v40, %s453_s22 }
 0x11c   :  { %205 = vrot.lane.b32.xlu0 %v221_v40, %s452_s21 }
 0x11d   :  { %196 = vrot.lane.b32.xlu1 %v221_v40, %s455_s24 }
 0x120   :  { %187 = vrot.lane.b32.xlu0 %v221_v40, %s454_s23 }
 0x121   :  { %178 = vrot.lane.b32.xlu1 %v221_v40, %s457_s26 }
 0x124   :  { %169 = vrot.lane.b32.xlu0 %v221_v40, %s456_s25 }
 0x125   :  { %160 = vrot.lane.b32.xlu1 %v221_v40, %s458_s27 }
 0x128   :  { %149 = vrot.lane.b32.xlu0 %v221_v40, %s445_s14 }
 0x12c   :  { %87 = vrot.lane.b32.xlu0 %v85_v31, %s459_s28  ;;  %v350_v31 = vrot.slane %v345_v30, %v50_v10 }
 0x17a   :  { %v118_v41 = vpop.permute.xlu0 %117 }
 0x17b   :  { %120 = vst.msk [vmem:[#allocation3 + $0x30] sm:$0xf] %vm83_vm12, %v118_v41  ;;  %v130_v42 = vpop.permute.xlu1 %129 }
 0x17c   :  { %132 = vst.msk [vmem:[#allocation3 + $0x40] sm:$0xf] %vm83_vm12, %v130_v42 }
 0x17e   :  { %v106_v43 = vpop.permute.xlu0 %105 }
 0x17f   :  { %108 = vst.msk [vmem:[#allocation3 + $0x20] sm:$0xf] %vm83_vm12, %v106_v43  ;;  %v124_v44 = vpop.permute.xlu1 %123 }
 0x180   :  { %126 = vst.msk [vmem:[#allocation3 + $0x38] sm:$0xf] %vm83_vm12, %v124_v44 }
 0x182   :  { %v94_v45 = vpop.permute.xlu0 %93 }
 0x183   :  { %96 = vst.msk [vmem:[#allocation3 + $0x10] sm:$0xf] %vm83_vm12, %v94_v45  ;;  %v112_v46 = vpop.permute.xlu1 %111 }
 0x184   :  { %114 = vst.msk [vmem:[#allocation3 + $0x28] sm:$0xf] %vm83_vm12, %v112_v46 }
 0x187   :  { %v100_v50 = vpop.permute.xlu1 %99 }
 0x188   :  { %102 = vst.msk [vmem:[#allocation3 + $0x18] sm:$0xf] %vm83_vm12, %v100_v50 }
 0x18a   :  { %v224_v47 = vpop.permute.xlu0 %223 }
 0x18b   :  { %v225_v49 = vrot.slane %v224_v47, 4  ;;  %v215_v54 = vpop.permute.xlu1 %214 }
 0x18c   :  { %v216_v55 = vrot.slane %v215_v54, 4 }
 0x18d   :  { %v227_v51 = vsel %vm226_vm14, %v224_v47, %v225_v49 }
 0x18e   :  { %229 = vst.msk [vmem:[#allocation3 + $0x40] sm:$0xff] %vm561_vm15, %v227_v51  ;;  %v206_v52 = vpop.permute.xlu0 %205  ;;  %v218_v57 = vsel %vm217_vm4, %v215_v54, %v216_v55 }
 0x18f   :  { %v207_v53 = vrot.slane %v206_v52, 4  ;;  %220 = vst.msk [vmem:[#allocation3 + $0x38] sm:$0xff] %vm561_vm15, %v218_v57  ;;  %v197_v60 = vpop.permute.xlu1 %196 }
 0x190   :  { %v198_v61 = vrot.slane %v197_v60, 4 }
 0x191   :  { %v209_v56 = vsel %vm208_vm0, %v206_v52, %v207_v53 }
 0x192   :  { %211 = vst.msk [vmem:[#allocation3 + $0x30] sm:$0xff] %vm561_vm15, %v209_v56  ;;  %v188_v58 = vpop.permute.xlu0 %187  ;;  %v200_v0 = vsel %vm199_vm5, %v197_v60, %v198_v61 }
 0x193   :  { %v189_v59 = vrot.slane %v188_v58, 4  ;;  %202 = vst.msk [vmem:[#allocation3 + $0x28] sm:$0xff] %vm561_vm15, %v200_v0  ;;  %v179_v6 = vpop.permute.xlu1 %178 }
 0x194   :  { %v180_v7 = vrot.slane %v179_v6, 4 }
 0x195   :  { %v191_v62 = vsel %vm190_vm1, %v188_v58, %v189_v59  ;;  %v239_v63 = vld [vmem:[#allocation3 + $0x40] sm:$0xff] }
 0x196   :  { %193 = vst.msk [vmem:[#allocation3 + $0x20] sm:$0xff] %vm561_vm15, %v191_v62  ;;  %v170_v1 = vpop.permute.xlu0 %169  ;;  %v400_v2 = vcombine.high %v239_v63, %v239_v63  ;;  %v399_v3 = vcombine.low %v239_v63, %v239_v63  ;;  %v182_v12 = vsel %vm181_vm7, %v179_v6, %v180_v7 }
 0x197   :  { %v171_v4 = vrot.slane %v170_v1, 4  ;;  %184 = vst.msk [vmem:[#allocation3 + $0x18] sm:$0xff] %vm561_vm15, %v182_v12  ;;  %v161_v16 = vpop.permute.xlu1 %160 }
 0x198   :  { %401 = vmatprep.subr.msk.bf16.mxu0 %vm68_vm2, %v400_v2  ;;  %v290_v8 = vsel %vm68_vm2, %v399_v3, 0  ;;  %v162_v18 = vrot.slane %v161_v16, 4  ;;  %vm285_vm2 = vcmask 588800  }
 0x199   :  { %v173_v11 = vsel %vm172_vm6, %v170_v1, %v171_v4  ;;  %302 = vmatpush1.bf16.msra.mxu0 %v290_v8  ;;  %v429_v14 = vld [vmem:[#allocation3 + $0x34] ss:$8 sps:$4 sm:$0xff]   ;;  %v431_v17 = vld [vmem:[#allocation3 + $0x30] ss:$8 sps:$4 sm:$0xff]  }
 0x19a   :  { %175 = vst.msk [vmem:[#allocation3 + $0x10] sm:$0xff] %vm561_vm15, %v173_v11  ;;  %v150_v13 = vpop.permute.xlu0 %149  ;;  %303 = vmatprep.subr.bf16.mxu0 %v429_v14  ;;  %v164_v22 = vsel %vm163_vm9, %v161_v16, %v162_v18 }
 0x19b   :  { %v151_v15 = vrot.slane %v150_v13, 4 }
 0x19d   :  { %v153_v19 = vsel %vm152_vm8, %v150_v13, %v151_v15  ;;  %304 = vmatpush1.bf16.msra.mxu0 %v431_v17  ;;  %v432_v21 = vld [vmem:[#allocation3 + $0x24] ss:$8 sps:$4 sm:$0xff]   ;;  %v434_v24 = vld [vmem:[#allocation3 + $0x20] ss:$8 sps:$4 sm:$0xff]  }
 0x19e   :  { %157 = vst.msk [vmem:[#allocation3] sm:$0xff] %vm561_vm15, %v153_v19  ;;  %v88_v20 = vpop.permute.xlu0 %87  ;;  %305 = vmatprep.subr.bf16.mxu0 %v432_v21 }
 0x19f   :  { %90 = vst.msk [vmem:[#allocation3 + $0x8] sm:$0xf] %vm83_vm12, %v88_v20 }
 0x1a0   :  { %166 = vst.msk [vmem:[#allocation3 + $0x8] sm:$0xff] %vm561_vm15, %v164_v22 }
 0x1a1   :  { %306 = vmatpush1.bf16.msra.mxu0 %v434_v24  ;;  %v435_v25 = vld [vmem:[#allocation3 + $0x14] ss:$8 sps:$4 sm:$0xff]   ;;  %v437_v26 = vld [vmem:[#allocation3 + $0x10] ss:$8 sps:$4 sm:$0xff]  }
 0x1a2   :  { %307 = vmatprep.subr.bf16.mxu0 %v435_v25 }
 0x1a5   :  { %308 = vmatpush1.bf16.msra.mxu0 %v437_v26 }
 0x1a7   :  { %v438_v27 = vld [vmem:[#allocation3 + $0x4] ss:$8 sps:$4 sm:$0xff]   ;;  %v440_v28 = vld [vmem:[#allocation3] ss:$8 sps:$4 sm:$0xff]  }
 0x1a8   :  { %309 = vmatprep.subr.bf16.mxu0 %v438_v27 }
 0x1a9   :  { %310 = vmatpush1.bf16.msra.mxu0 %v440_v28 }
 0x1ac   :  { %402 = vmatmul.mubr.msk.bf16.vlgmr.msra.gmra.mxu0 %vm285_vm2, %v230_v29 }
 0x26c   :  { %v329_v33 = vpop.f32.mrf.mxu0 }
 0x26d   :  { %v357_v35 = vmul.f32 %v350_v31, %v329_v33 }
 0x26e   :  { %v331_v34 = vpop.f32.mrf.mxu0 }
 0x26f   :  { %v406_v36 = vpack.c.bf16 %v331_v34, %v329_v33  ;;  %v358_v37 = vmul.f32 %v354_v32, %v331_v34  ;;  %v366_v42 = vmul.f32 %v357_v35, %v329_v33 }
 0x270   :  { %v333_v38 = vpop.f32.mrf.mxu0 }
 0x271   :  { %344 = vst.msk [vmem:[%s614_s6] sm:$0xff] %vm530_vm3, %v406_v36  ;;  %v367_v39 = vmul.f32 %v358_v37, %v331_v34  ;;  %v360_v40 = vsel %vm359_vm10, %v358_v37, 0.0 }
 0x272   :  { %v334_v41 = vpop.f32.mrf.mxu0  ;;  %v361_v10 = vadd.f32 %v360_v40, %v357_v35 }
 0x273   :  { %v368_v5 = vsel %vm359_vm10, %v367_v39, 0.0 }
 0x274   :  { %362 = vadd.xlane.f32.xlu1 %v361_v10  ;;  %v369_v9 = vadd.f32 %v368_v5, %v366_v42 }
 0x276   :  { %370 = vadd.xlane.f32.xlu0 %v369_v9 }
 0x2fd   :  { %v363_v43 = vpop.xlane.xlu1 %362 }
 0x2fe   :  { %365 = vst.msk [vmem:[%s615_s7] sm:$0xff] %vm364_vm11, %v363_v43 }
 0x2ff   :  { %v371_v23 = vpop.xlane.xlu0 %370 }
 0x300   :  { %372 = vst.msk [vmem:[%s616_s8] sm:$0xff] %vm364_vm11, %v371_v23 }

// kernel: basic_block_forward.7
= control target key start
LH: loop header
LB: loop body
LE: loop exit
PB: predicated region body
PF: predicated region fallthrough
CT: control target
= control target key end

     0   :  { %v83_v0 = vmov 0   ;;  %vm64_vm0 = vcmask 261120   ;;  %s156_s2 = inlined_call_operand.vmem [shape: f32[8,1], index: 2, kind: input, shape index: {}]   ;;  %s157_s1 = inlined_call_operand.vmem [shape: f32[8,1], index: 1, kind: input, shape index: {}]   ;;  %s158_s5 = inlined_call_operand.vmem [shape: f32[8,1], index: 5, kind: input, shape index: {}]   ;;  %s159_s4 = inlined_call_operand.vmem [shape: f32[8,1], index: 4, kind: input, shape index: {}]   ;;  %s160_s0 = inlined_call_operand.vmem [shape: bf16[1,8,160], index: 0, kind: input, shape index: {}]   ;;  %s161_s3 = inlined_call_operand.vmem [shape: bf16[1,8,160], index: 3, kind: input, shape index: {}]   ;;  %s162_s6 = inlined_call_operand.vmem [shape: f32[1,8,160], index: 6, kind: output, shape index: {0}]   ;;  %s163_s7 = inlined_call_operand.vmem [shape: f32[1,8,160], index: 7, kind: output, shape index: {1}]  }
   0x1   :  { %82 = vset.pattern.permute.xlu1 %v83_v0  ;;  %81 = vset.pattern.permute.xlu0 %v83_v0  ;;  %v36_v1 = vld [vmem:[%s156_s2] sm:$0xff] }
   0x2   :  { %v28_v2 = vld [vmem:[%s157_s1] sm:$0xff]  ;;  %39 = vperm.xlu1 %82, %v36_v1  }
   0x3   :  { %31 = vperm.xlu0 %81, %v28_v2   ;;  %v55_v3 = vld [vmem:[%s158_s5] sm:$0xff] }
   0x4   :  { %v47_v4 = vld [vmem:[%s159_s4] sm:$0xff] }
   0x5   :  { %v25_v5 = vld [vmem:[%s160_s0] sm:$0xff] }
   0x6   :  { %58 = vperm.xlu1 %82, %v55_v3   ;;  %v26_v6 = vunpack.c.l.bf16 %v25_v5  ;;  %v27_v7 = vunpack.c.h.bf16 %v25_v5  ;;  %v44_v8 = vld [vmem:[%s161_s3] sm:$0xff] }
   0x7   :  { %50 = vperm.xlu0 %81, %v47_v4   ;;  %v45_v13 = vunpack.c.l.bf16 %v44_v8  ;;  %v46_v14 = vunpack.c.h.bf16 %v44_v8 }
  0x7d   :  { %v40_v9 = vpop.permute.xlu1 %39 }
  0x7e   :  { %v32_v10 = vpop.permute.xlu0 %31 }
  0x7f   :  { %v34_v11 = vmul.f32 %v32_v10, %v26_v6  ;;  %v35_v12 = vmul.f32 %v32_v10, %v27_v7 }
  0x81   :  { %v42_v15 = vadd.f32 %v40_v9, %v34_v11  ;;  %v43_v16 = vadd.f32 %v40_v9, %v35_v12  ;;  %v59_v20 = vpop.permute.xlu1 %58 }
  0x82   :  { %v51_v17 = vpop.permute.xlu0 %50 }
  0x83   :  { %63 = vst [vmem:[%s162_s6] sm:$0xff] %v42_v15  ;;  %65 = vst.msk [vmem:[%s162_s6 + $0x8] sm:$0xff] %vm64_vm0, %v43_v16  ;;  %v53_v18 = vmul.f32 %v51_v17, %v45_v13  ;;  %v54_v19 = vmul.f32 %v51_v17, %v46_v14 }
  0x85   :  { %v61_v21 = vadd.f32 %v59_v20, %v53_v18  ;;  %v62_v22 = vadd.f32 %v59_v20, %v54_v19 }
  0x87   :  { %v66_v23 = vadd.f32 %v61_v21, %v42_v15  ;;  %v67_v24 = vadd.f32 %v62_v22, %v43_v16 }
  0x89   :  { %v68_v25 = vmax.f32 %v66_v23, 0.0  ;;  %v69_v26 = vmax.f32 %v67_v24, 0.0 }
  0x8b   :  { %70 = vst [vmem:[%s163_s7] sm:$0xff] %v68_v25  ;;  %71 = vst.msk [vmem:[%s163_s7 + $0x8] sm:$0xff] %vm64_vm0, %v69_v26 }

</bundles_post_ra>
